<compile_context>
chip_gen: v7x
topology: tpu7x:2x2x1
jax: 0.10.0
libtpu: 0.0.40
codegen_flags: <defaults>
</compile_context>

<pallas_src>
import math

import jax
import jax.numpy as jnp
from jax.experimental import pallas as pl
from jax.experimental.pallas import tpu as pltpu

_MIB = 1024 * 1024


# ----------------------------------------------------------------------------- kernels

def _make_mid_kernel(with_enc, hres_is_x):
    """Non-final SageConvLayer + activation/normalize/residual, fused with the
    neigh_linear of the *next* layer.  K-tiled accumulation over the adjacency."""

    def kernel(adj_ref, x_ref, invdeg_ref, hlin_ref, wls_ref, wln_ref, wn_next_ref,
               *rest):
        if with_enc:
            enc_ref, hnew_ref, hlin_next_ref, acc_ref = rest
        else:
            hnew_ref, hlin_next_ref, acc_ref = rest

        k = pl.program_id(1)

        @pl.when(k == 0)
        def _():
            acc_ref[...] = jnp.zeros_like(acc_ref)

        # int8 (0/1) adjacency tile -> bf16 right before the MXU dot; f32 accumulate.
        acc_ref[...] += jnp.dot(adj_ref[...].astype(jnp.bfloat16), hlin_ref[...],
                                preferred_element_type=jnp.float32)

        @pl.when(k == pl.num_programs(1) - 1)
        def _():
            h_agg = acc_ref[...] * invdeg_ref[...]                # [T, d_in]
            x = x_ref[...]                                        # [T, d_in] f32
            # linear on concat([x, h_agg], -1) via split weights (no in-kernel concat).
            z = (jnp.dot(x, wls_ref[...], preferred_element_type=jnp.float32)
                 + jnp.dot(h_agg, wln_ref[...], preferred_element_type=jnp.float32))

            hres = x if hres_is_x else None                       # layer 0: h_res == 0

            if with_enc:                                          # only layer L-2
                inv_nz = jax.lax.rsqrt(
                    jnp.maximum(jnp.sum(z * z, axis=1, keepdims=True), 1e-24))
                e = z * inv_nz
                if hres is not None:
                    e = e + hres
                enc_ref[...] = e

            a = jnp.maximum(z, 0.0)        # TODO(synk): activation assumed ReLU
            inv_na = jax.lax.rsqrt(
                jnp.maximum(jnp.sum(a * a, axis=1, keepdims=True), 1e-24))
            h_new = a * inv_na
            if hres is not None:
                h_new = h_new + hres
            hnew_ref[...] = h_new

            # fused neigh_linear of the next layer; bf16 so the next aggregation
            # operand leaves already in the MXU-friendly dtype.
            hlin_next_ref[...] = jnp.dot(
                h_new, wn_next_ref[...], preferred_element_type=jnp.float32
            ).astype(hlin_next_ref.dtype)

    return kernel


def _final_kernel(adj_ref, x_ref, invdeg_ref, hlin_ref, wls_ref, wln_ref,
                  out_ref, acc_ref):
    """Last SageConvLayer: no activation / normalize / residual."""
    k = pl.program_id(1)

    @pl.when(k == 0)
    def _():
        acc_ref[...] = jnp.zeros_like(acc_ref)

    acc_ref[...] += jnp.dot(adj_ref[...].astype(jnp.bfloat16), hlin_ref[...],
                            preferred_element_type=jnp.float32)

    @pl.when(k == pl.num_programs(1) - 1)
    def _():
        h_agg = acc_ref[...] * invdeg_ref[...]
        out_ref[...] = (jnp.dot(x_ref[...], wls_ref[...],
                                preferred_element_type=jnp.float32)
                        + jnp.dot(h_agg, wln_ref[...],
                                  preferred_element_type=jnp.float32))


# ----------------------------------------------------------------------------- tiling

def _vmem_bytes(tile_n, tile_k, d_in, n_hidden):
    """Budget-complete per-call VMEM estimate (worst-case mid-layer kernel)."""
    b = 2 * tile_n * tile_k * 1            # adj int8 tile, double-buffered
    b += 2 * tile_k * d_in * 2             # h_lin bf16 tile, double-buffered
    b += 2 * tile_n * d_in * 4             # x tile f32, double-buffered
    b += 2 * tile_n * 4                    # inv_deg tile
    b += 2 * d_in * n_hidden * 4           # wl_self + wl_neigh (single-buffered)
    b += n_hidden * n_hidden * 4           # wn_next (single-buffered)
    b += 2 * 2 * tile_n * n_hidden * 4     # enc + h_new f32 outputs, double-buffered
    b += 2 * tile_n * n_hidden * 2         # hlin_next bf16 output, double-buffered
    b += tile_n * d_in * 4                 # f32 accumulator scratch
    return b


def _vmem_capacity_bytes():
    try:
        cap = getattr(pltpu.get_tpu_info(), "vmem_capacity_bytes", None)
        if cap:
            return int(cap)
    except Exception:
        pass
    return 64 * _MIB                       # v7x per-TC VMEM: the conservative default


def _pick_tiles(n, d_max, n_hidden, budget):
    """Largest adjacency DMA slab whose total (budget-complete) VMEM fits."""
    tn_cands = [t for t in (512, 256, 128, 64, 32) if n % t == 0] or [n]
    tk_cands = [t for t in (4096, 2048, 1024, 512, 256, 128) if n % t == 0] or [n]
    fits = [(tn, tk) for tn in tn_cands for tk in tk_cands
            if _vmem_bytes(tn, tk, d_max, n_hidden) <= budget]
    if fits:   # maximize the DMA slab; tie-break on tall (MXU-friendly) row tiles
        return max(fits, key=lambda p: (p[0] * p[1], p[0]))
    return min(tn_cands), min(tk_cands)


# ----------------------------------------------------------------------------- wrapper

def full_graph_encoder_forward(adj, inputs, wn_ts, wl_ts, *, tile_n=None, tile_k=None):
    """FullGraphEncoder.forward(adj, inputs) -> (h, enc_feat_input).

    wn_ts[l] : pre-transposed neigh_linear weight of layer l, shape [d_l, d_l]
    wl_ts[l] : pre-transposed linear weight of layer l,       shape [2*d_l, n_hidden]
    """
    n = adj.shape[0]
    num_layers = len(wn_ts)
    assert num_layers >= 2 and len(wl_ts) == num_layers
    n_hidden = wl_ts[0].shape[1]
    d0 = inputs.shape[1]

    vmem_cap = _vmem_capacity_bytes()
    budget = int(vmem_cap * 0.70)          # tile-picking budget (headroom for Mosaic scratch)
    vmem_limit = int(vmem_cap * 0.80)      # ~100 MiB on v5e/v6e (128 MiB), ~51 MiB on v7x

    if tile_n is None or tile_k is None:
        ptn, ptk = _pick_tiles(n, max(d0, n_hidden), n_hidden, budget)
        tile_n = tile_n or ptn
        tile_k = tile_k or ptk
    assert n % tile_n == 0 and n % tile_k == 0, "node count must be divisible by tiles"
    assert tile_n == n or tile_n % 32 == 0, "row tile must be a multiple of 32 (int8 adj)"
    assert tile_k == n or tile_k % 128 == 0, "contraction tile must be a multiple of 128"

    grid = (n // tile_n, n // tile_k)
    cp = pltpu.CompilerParams(
        dimension_semantics=("parallel", "arbitrary"),   # megacore-shard row tiles
        vmem_limit_bytes=vmem_limit)

    # adjacency: int8 in HBM (0/1 is exact), cast to bf16 inside the kernel.
    adj_i8 = adj.astype(jnp.int8)
    # 1 / (degree + 1): one cheap XLA reduce, exact in f32.
    inv_deg = (1.0 / (jnp.sum(adj, axis=1, keepdims=True) + 1.0)).astype(jnp.float32)

    adj_spec = pl.BlockSpec((tile_n, tile_k), lambda i, k: (i, k))

    def row_spec(cols):                                  # per-row-tile operand / output
        return pl.BlockSpec((tile_n, cols), lambda i, k: (i, 0))

    def ktile_spec(cols):                                # contraction-tiled operand
        return pl.BlockSpec((tile_k, cols), lambda i, k: (k, 0))

    def const_spec(shape):
        # Constant block index -> DMA'd once; single-buffer to halve its footprint.
        try:
            return pl.BlockSpec(shape, lambda i, k: (0, 0),
                                pipeline_mode=pl.Buffered(1))
        except TypeError:                                # older jax without pipeline_mode
            return pl.BlockSpec(shape, lambda i, k: (0, 0))

    # ---- layer-0 neigh_linear as a plain XLA GEMM; bf16 result feeds the aggregation.
    h_lin = jnp.dot(inputs, wn_ts[0],
                    preferred_element_type=jnp.float32).astype(jnp.bfloat16)

    h = inputs
    enc = None

    # ---- all layers except the last ----
    for l in range(num_layers - 1):
        d_in = h.shape[1]
        with_enc = (l == num_layers - 2)     # enc only produced on layer L-2
        hres_is_x = (l >= 1)                 # after layer 0, h_res IS the layer input
        wl_self = wl_ts[l][:d_in, :]
        wl_neigh = wl_ts[l][d_in:, :]
        wn_next = wn_ts[l + 1]
        d_next = wn_next.shape[1]

        out_shapes = (jax.ShapeDtypeStruct((n, n_hidden), jnp.float32),   # h_new
                      jax.ShapeDtypeStruct((n, d_next), jnp.bfloat16))    # next h_lin
        out_specs = [row_spec(n_hidden), row_spec(d_next)]
        if with_enc:
            out_shapes = (jax.ShapeDtypeStruct((n, n_hidden), jnp.float32),) + out_shapes
            out_specs = [row_spec(n_hidden)] + out_specs

        outs = pl.pallas_call(
            _make_mid_kernel(with_enc, hres_is_x),
            grid=grid,
            out_shape=out_shapes,
            in_specs=[adj_spec,                    # adj (tile_n, tile_k) int8
                      row_spec(d_in),              # x tile
                      row_spec(1),                 # 1/(deg+1) tile
                      ktile_spec(d_in),            # h_lin (tile_k, d_in) bf16
                      const_spec(wl_self.shape),
                      const_spec(wl_neigh.shape),
                      const_spec(wn_next.shape)],
            out_specs=out_specs,
            scratch_shapes=[pltpu.VMEM((tile_n, d_in), jnp.float32)],
            compiler_params=cp,
        )(adj_i8, h, inv_deg, h_lin, wl_self, wl_neigh, wn_next)

        if with_enc:
            enc, h, h_lin = outs
        else:
            h, h_lin = outs

    # ---- final layer ----
    d_in = h.shape[1]
    wl_self = wl_ts[-1][:d_in, :]
    wl_neigh = wl_ts[-1][d_in:, :]
    h_final = pl.pallas_call(
        _final_kernel,
        grid=grid,
        out_shape=jax.ShapeDtypeStruct((n, n_hidden), jnp.float32),
        in_specs=[adj_spec, row_spec(d_in), row_spec(1), ktile_spec(d_in),
                  const_spec(wl_self.shape), const_spec(wl_neigh.shape)],
        out_specs=row_spec(n_hidden),
        scratch_shapes=[pltpu.VMEM((tile_n, d_in), jnp.float32)],
        compiler_params=cp,
    )(adj_i8, h, inv_deg, h_lin, wl_self, wl_neigh)

    return h_final, enc


# ----------------------------------------------------------------------------- reference & test

def _xavier_uniform(key, out_features, in_features, gain):
    bound = gain * math.sqrt(6.0 / (in_features + out_features))
    return jax.random.uniform(key, (out_features, in_features), jnp.float32,
                              -bound, bound)


def _reference(adj, inputs, wn_ts, wl_ts):
    def conv(x, wn_t, wl_t):
        hl = x @ wn_t
        ha = (adj @ hl) / (jnp.sum(adj, axis=1, keepdims=True) + 1.0)
        return jnp.concatenate([x, ha], axis=-1) @ wl_t

    def normalize(v):
        return v / jnp.maximum(jnp.linalg.norm(v, axis=1, keepdims=True), 1e-12)

    num_layers = len(wn_ts)
    h = inputs
    enc = h
    h_res = 0.0
    for l in range(num_layers):
        h = conv(h, wn_ts[l], wl_ts[l])
        if l == num_layers - 2:
            enc = normalize(h) + h_res
        if l != num_layers - 1:
            h = normalize(jnp.maximum(h, 0.0)) + h_res
            h_res = h
    return h, enc


if __name__ == "__main__":
    # Small, lane-dense demo shapes (multiples of 128); n_layers=2 -> 2 SageConv layers.
    N, IN_FEATS, N_HIDDEN = 256, 128, 128
    TILE_N, TILE_K = 128, 128          # grid (2, 2): exercises both grid axes + accumulator
    GAIN = math.sqrt(2.0)              # nn.init.calculate_gain('relu')

    key = jax.random.PRNGKey(0)
    k_adj, k_x, k_wn0, k_wl0, k_wn1, k_wl1 = jax.random.split(key, 6)

    adj = jax.random.bernoulli(k_adj, 0.3, (N, N)).astype(jnp.float32)
    inputs = jax.random.normal(k_x, (N, IN_FEATS), jnp.float32)

    # layer 0: SageConvLayer(in_feats, n_hidden)
    wn0 = _xavier_uniform(k_wn0, IN_FEATS, IN_FEATS, GAIN)        # neigh_linear
    wl0 = _xavier_uniform(k_wl0, N_HIDDEN, 2 * IN_FEATS, GAIN)    # linear
    # layer 1: SageConvLayer(n_hidden, n_hidden)
    wn1 = _xavier_uniform(k_wn1, N_HIDDEN, N_HIDDEN, GAIN)
    wl1 = _xavier_uniform(k_wl1, N_HIDDEN, 2 * N_HIDDEN, GAIN)

    # Pre-transpose so kernels compute x @ W.
    wn_ts = [wn0.T, wn1.T]
    wl_ts = [wl0.T, wl1.T]

    h_out, enc_out = full_graph_encoder_forward(adj, inputs, wn_ts, wl_ts,
                                                tile_n=TILE_N, tile_k=TILE_K)
    h_out = jax.block_until_ready(h_out)
    enc_out = jax.block_until_ready(enc_out)

    h_ref, enc_ref = _reference(adj, inputs, wn_ts, wl_ts)

    assert h_out.shape == (N, N_HIDDEN) and enc_out.shape == (N, N_HIDDEN)
    # bf16 aggregation operand -> compare against the f32 reference with a modest tolerance.
    assert jnp.allclose(h_out, h_ref, atol=2e-2, rtol=2e-2), "h mismatch vs reference"
    assert jnp.allclose(enc_out, enc_ref, atol=2e-2, rtol=2e-2), "enc mismatch vs reference"

    print("KERNEL_OK")
</pallas_src>

<mosaic_0001>
module attributes {stable_mosaic.version = 11 : i64} {
  func.func @kernel(%arg0: i32, %arg1: i32, %arg2: memref<128x128xi8, #tpu.memory_space<vmem>>, %arg3: memref<128x128xf32, #tpu.memory_space<vmem>>, %arg4: memref<128x1xf32, #tpu.memory_space<vmem>>, %arg5: memref<128x128xbf16, #tpu.memory_space<vmem>>, %arg6: memref<128x128xf32, #tpu.memory_space<vmem>>, %arg7: memref<128x128xf32, #tpu.memory_space<vmem>>, %arg8: memref<128x128xf32, #tpu.memory_space<vmem>>, %arg9: memref<128x128xf32, #tpu.memory_space<vmem>>, %arg10: memref<128x128xf32, #tpu.memory_space<vmem>>, %arg11: memref<128x128xbf16, #tpu.memory_space<vmem>>, %arg12: memref<128x128xf32, #tpu.memory_space<vmem>>) attributes {dimension_semantics = [#tpu.dimension_semantics<parallel>, #tpu.dimension_semantics<arbitrary>], iteration_bounds = array<i64: 2, 2>, scalar_prefetch = 0 : i64, scratch_operands = 1 : i64, tpu.core_type = #tpu.core_type<tc>, window_params = [{transform_indices = @transform_0, window_bounds = array<i64: 128, 128>}, {transform_indices = @transform_1, window_bounds = array<i64: 128, 128>}, {transform_indices = @transform_2, window_bounds = array<i64: 128, 1>}, {transform_indices = @transform_3, window_bounds = array<i64: 128, 128>}, {pipeline_mode = #tpu.pipeline_mode<synchronous>, transform_indices = @transform_4, window_bounds = array<i64: 128, 128>}, {pipeline_mode = #tpu.pipeline_mode<synchronous>, transform_indices = @transform_5, window_bounds = array<i64: 128, 128>}, {pipeline_mode = #tpu.pipeline_mode<synchronous>, transform_indices = @transform_6, window_bounds = array<i64: 128, 128>}, {transform_indices = @transform_7, window_bounds = array<i64: 128, 128>}, {transform_indices = @transform_8, window_bounds = array<i64: 128, 128>}, {transform_indices = @transform_9, window_bounds = array<i64: 128, 128>}]} {
    %c0_i32 = arith.constant 0 : i32
    %0 = arith.cmpi eq, %arg1, %c0_i32 : i32
    %1 = arith.extui %0 : i1 to i32
    %c0_i32_0 = arith.constant 0 : i32
    %2 = arith.cmpi ne, %1, %c0_i32_0 : i32
    scf.if %2 {
      %cst_9 = arith.constant 0.000000e+00 : f32
      %13 = vector.broadcast %cst_9 : f32 to vector<128x128xf32>
      %c0_10 = arith.constant 0 : index
      %c0_11 = arith.constant 0 : index
      %14 = vector.load %arg12[%c0_10, %c0_11] : memref<128x128xf32, #tpu.memory_space<vmem>>, vector<128x128xf32>
      tpu.vector_store %arg12[%c0_10, %c0_11], %13 {strides = array<i32>} : memref<128x128xf32, #tpu.memory_space<vmem>>, vector<128x128xf32>,
    } else {
    }
    %c0 = arith.constant 0 : index
    %c0_1 = arith.constant 0 : index
    %3 = vector.load %arg12[%c0, %c0_1] : memref<128x128xf32, #tpu.memory_space<vmem>>, vector<128x128xf32>
    %c0_2 = arith.constant 0 : index
    %c0_3 = arith.constant 0 : index
    %4 = vector.load %arg2[%c0_2, %c0_3] : memref<128x128xi8, #tpu.memory_space<vmem>>, vector<128x128xi8>
    %5 = arith.sitofp %4 : vector<128x128xi8> to vector<128x128xbf16>
    %c0_4 = arith.constant 0 : index
    %c0_5 = arith.constant 0 : index
    %6 = vector.load %arg5[%c0_4, %c0_5] : memref<128x128xbf16, #tpu.memory_space<vmem>>, vector<128x128xbf16>
    %cst = arith.constant dense<0.000000e+00> : vector<128x128xf32>
    %7 = tpu.matmul %5, %6, %cst {dimension_numbers = #tpu.dot_dimension_numbers<[1], [0], [0], [1], [0, 0, 1, 1], [], []>} : vector<128x128xbf16>, vector<128x128xbf16>, vector<128x128xf32> -> vector<128x128xf32>
    %8 = arith.addf %3, %7 : vector<128x128xf32>
    %c0_6 = arith.constant 0 : index
    %c0_7 = arith.constant 0 : index
    %9 = vector.load %arg12[%c0_6, %c0_7] : memref<128x128xf32, #tpu.memory_space<vmem>>, vector<128x128xf32>
    tpu.vector_store %arg12[%c0_6, %c0_7], %8 {strides = array<i32>} : memref<128x128xf32, #tpu.memory_space<vmem>>, vector<128x128xf32>,
    %c1_i32 = arith.constant 1 : i32
    %10 = arith.cmpi eq, %arg1, %c1_i32 : i32
    %11 = arith.extui %10 : i1 to i32
    %c0_i32_8 = arith.constant 0 : i32
    %12 = arith.cmpi ne, %11, %c0_i32_8 : i32
    scf.if %12 {
      %c0_9 = arith.constant 0 : index
      %c0_10 = arith.constant 0 : index
      %13 = vector.load %arg12[%c0_9, %c0_10] : memref<128x128xf32, #tpu.memory_space<vmem>>, vector<128x128xf32>
      %c0_11 = arith.constant 0 : index
      %c0_12 = arith.constant 0 : index
      %14 = vector.load %arg4[%c0_11, %c0_12] : memref<128x1xf32, #tpu.memory_space<vmem>>, vector<128x1xf32>
      %15 = vector.broadcast %14 : vector<128x1xf32> to vector<128x128xf32>
      %16 = arith.mulf %13, %15 : vector<128x128xf32>
      %c0_13 = arith.constant 0 : index
      %c0_14 = arith.constant 0 : index
      %17 = vector.load %arg3[%c0_13, %c0_14] : memref<128x128xf32, #tpu.memory_space<vmem>>, vector<128x128xf32>
      %c0_15 = arith.constant 0 : index
      %c0_16 = arith.constant 0 : index
      %18 = vector.load %arg6[%c0_15, %c0_16] : memref<128x128xf32, #tpu.memory_space<vmem>>, vector<128x128xf32>
      %cst_17 = arith.constant dense<0.000000e+00> : vector<128x128xf32>
      %19 = tpu.matmul %17, %18, %cst_17 {dimension_numbers = #tpu.dot_dimension_numbers<[1], [0], [0], [1], [0, 0, 1, 1], [], []>} : vector<128x128xf32>, vector<128x128xf32>, vector<128x128xf32> -> vector<128x128xf32>
      %c0_18 = arith.constant 0 : index
      %c0_19 = arith.constant 0 : index
      %20 = vector.load %arg7[%c0_18, %c0_19] : memref<128x128xf32, #tpu.memory_space<vmem>>, vector<128x128xf32>
      %cst_20 = arith.constant dense<0.000000e+00> : vector<128x128xf32>
      %21 = tpu.matmul %16, %20, %cst_20 {dimension_numbers = #tpu.dot_dimension_numbers<[1], [0], [0], [1], [0, 0, 1, 1], [], []>} : vector<128x128xf32>, vector<128x128xf32>, vector<128x128xf32> -> vector<128x128xf32>
      %22 = arith.addf %19, %21 : vector<128x128xf32>
      %23 = arith.mulf %22, %22 : vector<128x128xf32>
      %cst_21 = arith.constant dense<0.000000e+00> : vector<128xf32>
      %24 = vector.multi_reduction <add>, %23, %cst_21 [1] : vector<128x128xf32> to vector<128xf32>
      %25 = vector.shape_cast %24 : vector<128xf32> to vector<128x1xf32>
      %cst_22 = arith.constant 1.000000e-24 : f32
      %26 = vector.broadcast %cst_22 : f32 to vector<128x1xf32>
      %27 = arith.maximumf %25, %26 : vector<128x1xf32>
      %28 = math.rsqrt %27 : vector<128x1xf32>
      %29 = vector.broadcast %28 : vector<128x1xf32> to vector<128x128xf32>
      %30 = arith.mulf %22, %29 : vector<128x128xf32>
      %c0_23 = arith.constant 0 : index
      %c0_24 = arith.constant 0 : index
      %31 = vector.load %arg9[%c0_23, %c0_24] : memref<128x128xf32, #tpu.memory_space<vmem>>, vector<128x128xf32>
      tpu.vector_store %arg9[%c0_23, %c0_24], %30 {strides = array<i32>} : memref<128x128xf32, #tpu.memory_space<vmem>>, vector<128x128xf32>,
      %cst_25 = arith.constant 0.000000e+00 : f32
      %32 = vector.broadcast %cst_25 : f32 to vector<128x128xf32>
      %33 = arith.maximumf %22, %32 : vector<128x128xf32>
      %34 = arith.mulf %33, %33 : vector<128x128xf32>
      %cst_26 = arith.constant dense<0.000000e+00> : vector<128xf32>
      %35 = vector.multi_reduction <add>, %34, %cst_26 [1] : vector<128x128xf32> to vector<128xf32>
      %36 = vector.shape_cast %35 : vector<128xf32> to vector<128x1xf32>
      %cst_27 = arith.constant 1.000000e-24 : f32
      %37 = vector.broadcast %cst_27 : f32 to vector<128x1xf32>
      %38 = arith.maximumf %36, %37 : vector<128x1xf32>
      %39 = math.rsqrt %38 : vector<128x1xf32>
      %40 = vector.broadcast %39 : vector<128x1xf32> to vector<128x128xf32>
      %41 = arith.mulf %33, %40 : vector<128x128xf32>
      %c0_28 = arith.constant 0 : index
      %c0_29 = arith.constant 0 : index
      %42 = vector.load %arg10[%c0_28, %c0_29] : memref<128x128xf32, #tpu.memory_space<vmem>>, vector<128x128xf32>
      tpu.vector_store %arg10[%c0_28, %c0_29], %41 {strides = array<i32>} : memref<128x128xf32, #tpu.memory_space<vmem>>, vector<128x128xf32>,
      %c0_30 = arith.constant 0 : index
      %c0_31 = arith.constant 0 : index
      %43 = vector.load %arg8[%c0_30, %c0_31] : memref<128x128xf32, #tpu.memory_space<vmem>>, vector<128x128xf32>
      %cst_32 = arith.constant dense<0.000000e+00> : vector<128x128xf32>
      %44 = tpu.matmul %41, %43, %cst_32 {dimension_numbers = #tpu.dot_dimension_numbers<[1], [0], [0], [1], [0, 0, 1, 1], [], []>} : vector<128x128xf32>, vector<128x128xf32>, vector<128x128xf32> -> vector<128x128xf32>
      %45 = arith.truncf %44 : vector<128x128xf32> to vector<128x128xbf16>
      %c0_33 = arith.constant 0 : index
      %c0_34 = arith.constant 0 : index
      %46 = vector.load %arg11[%c0_33, %c0_34] : memref<128x128xbf16, #tpu.memory_space<vmem>>, vector<128x128xbf16>
      tpu.vector_store %arg11[%c0_33, %c0_34], %45 {strides = array<i32>} : memref<128x128xbf16, #tpu.memory_space<vmem>>, vector<128x128xbf16>,
    } else {
    }
    return
  }
  func.func @transform_0(%arg0: i32, %arg1: i32) -> (i32, i32) {
    %c0_i32 = arith.constant 0 : i32
    return %arg0, %arg1 : i32, i32
  }
  func.func @transform_1(%arg0: i32, %arg1: i32) -> (i32, i32) {
    %c0_i32 = arith.constant 0 : i32
    %c0_i32_0 = arith.constant 0 : i32
    return %arg0, %c0_i32 : i32, i32
  }
  func.func @transform_2(%arg0: i32, %arg1: i32) -> (i32, i32) {
    %c0_i32 = arith.constant 0 : i32
    %c0_i32_0 = arith.constant 0 : i32
    return %arg0, %c0_i32 : i32, i32
  }
  func.func @transform_3(%arg0: i32, %arg1: i32) -> (i32, i32) {
    %c0_i32 = arith.constant 0 : i32
    %c0_i32_0 = arith.constant 0 : i32
    return %arg1, %c0_i32 : i32, i32
  }
  func.func @transform_4(%arg0: i32, %arg1: i32) -> (i32, i32) {
    %c0_i32 = arith.constant 0 : i32
    %c0_i32_0 = arith.constant 0 : i32
    %c0_i32_1 = arith.constant 0 : i32
    return %c0_i32, %c0_i32_0 : i32, i32
  }
  func.func @transform_5(%arg0: i32, %arg1: i32) -> (i32, i32) {
    %c0_i32 = arith.constant 0 : i32
    %c0_i32_0 = arith.constant 0 : i32
    %c0_i32_1 = arith.constant 0 : i32
    return %c0_i32, %c0_i32_0 : i32, i32
  }
  func.func @transform_6(%arg0: i32, %arg1: i32) -> (i32, i32) {
    %c0_i32 = arith.constant 0 : i32
    %c0_i32_0 = arith.constant 0 : i32
    %c0_i32_1 = arith.constant 0 : i32
    return %c0_i32, %c0_i32_0 : i32, i32
  }
  func.func @transform_7(%arg0: i32, %arg1: i32) -> (i32, i32) {
    %c0_i32 = arith.constant 0 : i32
    %c0_i32_0 = arith.constant 0 : i32
    return %arg0, %c0_i32 : i32, i32
  }
  func.func @transform_8(%arg0: i32, %arg1: i32) -> (i32, i32) {
    %c0_i32 = arith.constant 0 : i32
    %c0_i32_0 = arith.constant 0 : i32
    return %arg0, %c0_i32 : i32, i32
  }
  func.func @transform_9(%arg0: i32, %arg1: i32) -> (i32, i32) {
    %c0_i32 = arith.constant 0 : i32
    %c0_i32_0 = arith.constant 0 : i32
    return %arg0, %c0_i32 : i32, i32
  }
}

</mosaic_0001>

<bundles_post_ra>
// kernel: tpu_custom_call.1
= control target key start
LH: loop header
LB: loop body
LE: loop exit
PB: predicated region body
PF: predicated region fallthrough
CT: control target
= control target key end

     0   :  { %s4064_s0 = inlined_call_operand.hbm [shape: s8[256,256], index: 0, kind: input, shape index: {}]   ;;  %s4065_s1 = inlined_call_operand.vmem [shape: f32[256,128], index: 1, kind: input, shape index: {}]   ;;  %s4066_s2 = inlined_call_operand.vmem [shape: f32[256,1], index: 2, kind: input, shape index: {}]   ;;  %s4067_s3 = inlined_call_operand.hbm [shape: bf16[256,128], index: 3, kind: input, shape index: {}]   ;;  %s4068_s4 = inlined_call_operand.hbm [shape: f32[128,128], index: 4, kind: input, shape index: {}]   ;;  %s4069_s5 = inlined_call_operand.hbm [shape: f32[128,128], index: 5, kind: input, shape index: {}]   ;;  %s4070_s6 = inlined_call_operand.hbm [shape: f32[128,128], index: 6, kind: input, shape index: {}]   ;;  %s4071_s7 = inlined_call_operand.hbm [shape: f32[256,128], index: 7, kind: output, shape index: {0}]   ;;  %s4072_s8 = inlined_call_operand.hbm [shape: f32[256,128], index: 8, kind: output, shape index: {1}]   ;;  %s4073_s9 = inlined_call_operand.hbm [shape: bf16[256,128], index: 9, kind: output, shape index: {2}]  }
   0x1   :  { %4102 = sst [smem:[#allocation32_spill]] %s4064_s0 }
   0x2   :  { %4103 = sst [smem:[#allocation33_spill]] %s4065_s1 }
   0x3   :  { %4104 = sst [smem:[#allocation34_spill]] %s4066_s2 }
   0x4   :  { %4105 = sst [smem:[#allocation35_spill]] %s4067_s3 }
   0x5   :  { %4106 = sst [smem:[#allocation36_spill]] %s4068_s4 }
   0x6   :  { %4107 = sst [smem:[#allocation37_spill]] %s4069_s5 }
   0x7   :  { %4108 = sst [smem:[#allocation38_spill]] %s4070_s6 }
   0x8   :  { %4109 = sst [smem:[#allocation39_spill]] %s4071_s7 }
   0x9   :  { %4110 = sst [smem:[#allocation40_spill]] %s4072_s8 }
   0xa   :  { %4111 = sst [smem:[#allocation41_spill]] %s4073_s9 }
   0xb   :  { %15 = vsyncpa [#allocation4], 0 }
   0xc   :  { %17 = vsyncpa [#allocation4 + $0x1], 0 }
   0xd   :  { %18 = vsyncpa [#allocation7], 0 }
   0xe   :  { %20 = vsyncpa [#allocation7 + $0x1], 0 }
   0xf   :  { %21 = vsyncpa [#allocation10], 0 }
  0x10   :  { %22 = vsyncpa [#allocation5], 0 }
  0x11   :  { %24 = vsyncpa [#allocation5 + $0x1], 0 }
  0x12   :  { %25 = vsyncpa [#allocation14], 0 }
  0x13   :  { %27 = vsyncpa [#allocation14 + $0x1], 0  ;;  %s3250_s30 = smov 0   ;;  %s3252_s10 = smov 0  }
  0x14   :  { %s3254_s11 = smov 0   ;;  %s3256_s12 = smov 0  }
  0x15   :  { %s3258_s13 = smov 0   ;;  %s3260_s14 = smov 0  }
  0x16   :  { %s3262_s15 = smov 0   ;;  %s3264_s16 = smov 0  }
  0x17   :  { %s3266_s17 = smov 0   ;;  %s3268_s18 = smov 0  }
  0x18   :  { %s3270_s19 = smov 0   ;;  %s3272_s20 = smov 0  }
  0x19   :  { %s3274_s21 = smov 0   ;;  %s3276_s22 = smov 0  }
  0x1a LB: > { %4112 = sst [smem:[#allocation22_spill]] %s3127_s30  ;;  %s3317_s23 = sadd.s32 4294967295, %s3179_s22   ;;  %s3179_s22 = sphi %s3276_s22, %s33_s22   ;;  %s3175_s21 = sphi %s3274_s21, %s4187_s21   ;;  %s3171_s20 = sphi %s3272_s20, %s4186_s20   ;;  %s3167_s19 = sphi %s3270_s19, %s4185_s19   ;;  %s3163_s18 = sphi %s3268_s18, %s4184_s18   ;;  %s3159_s17 = sphi %s3266_s17, %s4183_s17   ;;  %s3155_s16 = sphi %s3264_s16, %s4182_s16   ;;  %s3151_s15 = sphi %s3262_s15, %s4181_s15   ;;  %s3147_s14 = sphi %s3260_s14, %s4180_s14   ;;  %s3143_s13 = sphi %s3258_s13, %s4179_s13   ;;  %s3139_s12 = sphi %s3256_s12, %s4178_s12   ;;  %s3135_s11 = sphi %s3254_s11, %s4177_s11   ;;  %s3131_s10 = sphi %s3252_s10, %s4176_s10   ;;  %s3127_s30 = sphi %s3250_s30, %s4172_s30  }
  0x1b   : > { %4113 = sst [smem:[#allocation23_spill]] %s3131_s10  ;;  %s4074_s24 = sadd.s32 4294967294, %s3179_s22  }
  0x1c   : > { %4114 = sst [smem:[#allocation24_spill]] %s3163_s18  ;;  %p67_p0 = scmp.ne.s32.totalorder %s3155_s16, %s3151_s15 }
  0x1d   : > { %4115 = sst [smem:[#allocation25_spill]] %s3167_s19  ;;  %p4082_p1 = scmp.eq.s32.totalorder %s3317_s23, 0 }
  0x1e   : > { %4116 = sst [smem:[#allocation26_spill]] %s3317_s23  ;;  %p145_p2 = scmp.ne.s32.totalorder %s3143_s13, %s3139_s12 }
  0x1f   : > { %p3326_p3 = por %p4082_p1, %p67_p0  ;;  %p231_p4 = scmp.ne.s32.totalorder %s3135_s11, %s3131_s10 }
  0x20   : > { %p3334_p5 = por %p145_p2, %p4082_p1  ;;  %p232_p6 = scmp.eq.s32.totalorder %s3317_s23, 3 }
  0x21   : > { %s4117_s26 = scalar_select %p3326_p3, 1, 0 }
  0x22   : > { %s4118_s27 = scalar_select %p3334_p5, 1, 0 }
  0x23   : > { %p237_p7 = scmp.ne.s32.totalorder %s3131_s10, %s3127_s30  ;;  %p238_p8 = scmp.eq.s32.totalorder %s4074_s24, 3 }
  0x24   : > { %4119 = sst [smem:[#allocation27_spill]] %s4118_s27  ;;  %p3343_p9 = por %p232_p6, %p231_p4 }
  0x25   : > { %p1990_p10 = scmp.ge.s32.totalorder %s3179_s22, 1  ;;  %p3348_p11 = por %p238_p8, %p237_p7 }
  0x26   : > { %s4120_s28 = scalar_select %p3343_p9, 1, 0 }
  0x27   : > { %s4122_s29 = scalar_select %p3348_p11, 1, 0 }
  0x28   : > { %4121 = sst [smem:[#allocation28_spill]] %s4120_s28  ;;  %p297_p12 = scmp.lt.s32.totalorder %s3179_s22, 5 }
  0x29   : > { %4123 = sst [smem:[#allocation29_spill]] %s4122_s29  ;;  %s3181_s15 = smov [#allocation8]  }
  0x2a   : > { %p3353_p13 = pnand %p1990_p10, %p297_p12  ;;  %s309_s25 = sshll.u32 %s3181_s15, 4  ;;  %s3357_s25 = int_to_ptr.vmem [resolvable:$true] %s309_s25 }
  0x2b   : > { %s3182_s30 = smov [#allocation9]   ;;  %s3183_s9 = smov [#allocation11]  }
  0x2c   : > { %s4124_s12 = scalar_select %p3353_p13, 1, 0 }
  0x2d   : > { %p2582_p0 = pneg %p3353_p13  ;;  %s322_s29 = sshll.u32 %s3182_s30, 4  ;;  %s3367_s29 = int_to_ptr.vmem [resolvable:$true] %s322_s29 }
  0x2e   : > { %s3369_s7 = sshll.u32 %s3183_s9, 4  ;;  %s4126_s4 = sld [smem:[#allocation36_spill]]  ;;  %s336_s7 = int_to_ptr.vmem [resolvable:$true] %s3369_s7 }
  0x2f   : > { %p3363_p2 = pnand %p2582_p0, %p4082_p1 }
  0x31   : > { %p3379_p6 = pneg %p3363_p2 }
  0x34   : > { %s2817_s15 = scalar_lea.hbm %s4126_s4, 2048 }
  0x35   : > { %p2818_p4 = scmp.ne.s32.totalorder %s4126_s4, %s2817_s15  ;;  %p2824_p10 = scmp.lt.u32.totalorder %s2817_s15, %s4126_s4 }
  0x37   : > { %p2820_p7 = pnand %p3379_p6, %p2818_p4 }
  0x39   : > { %p2821_p8 = pneg %p2820_p7 }
  0x3b   : > { %p2826_p12 = pnand %p2824_p10, %p2821_p8 }
  0x3d   : > { %2829 = shalt.err (!%p2826_p12)
}
  0x3e   : > { %s2830_s2 = scalar_lea.vmem %s3357_s25, 2048  ;;  %p2838_p9 = scmp.lt.s32.totalorder %s3357_s25, %s3357_s25 }
  0x3f   : > { %p2831_p0 = scmp.ne.s32.totalorder %s3357_s25, %s2830_s2  ;;  %p2839_p5 = scmp.lt.s32.totalorder %s2830_s2, %s2830_s2 }
  0x41   : > { %p2833_p1 = pnand %p2831_p0, %p3379_p6  ;;  %p2840_p4 = por %p2839_p5, %p2838_p9 }
  0x43   : > { %p2834_p11 = pneg %p2833_p1 }
  0x45   : > { %p2841_p7 = pnand %p2840_p4, %p2834_p11 }
  0x47   : > { %2844 = shalt.err (!%p2841_p7)
}
  0x48   : > { %s4093_s8 = smov 128   ;;  %s4094_s18 = smov 8  }
  0x49   : > { %2585 = dma.hbm_to_vmem [thread:$0]  (!%p3363_p2), %s4126_s4, 2048, %s3357_s25, [#allocation7], %s4093_s8, %s4093_s8, %s4094_s18  }
  0x4a   : > { %s4128_s5 = sld [smem:[#allocation37_spill]] }
  0x50   : > { %s2845_s2 = scalar_lea.hbm %s4128_s5, 2048 }
  0x51   : > { %p2846_p1 = scmp.ne.s32.totalorder %s4128_s5, %s2845_s2  ;;  %p2852_p11 = scmp.lt.u32.totalorder %s2845_s2, %s4128_s5 }
  0x53   : > { %p2848_p5 = pnand %p2846_p1, %p3379_p6 }
  0x55   : > { %p2849_p9 = pneg %p2848_p5 }
  0x57   : > { %p2854_p8 = pnand %p2852_p11, %p2849_p9 }
  0x59   : > { %2857 = shalt.err (!%p2854_p8)
}
  0x5a   : > { %s2858_s25 = scalar_lea.vmem %s3367_s29, 2048  ;;  %p2866_p4 = scmp.lt.s32.totalorder %s3367_s29, %s3367_s29 }
  0x5b   : > { %p2859_p10 = scmp.ne.s32.totalorder %s3367_s29, %s2858_s25  ;;  %p2867_p7 = scmp.lt.s32.totalorder %s2858_s25, %s2858_s25 }
  0x5d   : > { %p2861_p12 = pnand %p2859_p10, %p3379_p6  ;;  %p2868_p1 = por %p2867_p7, %p2866_p4 }
  0x5f   : > { %p2862_p0 = pneg %p2861_p12 }
  0x61   : > { %p2869_p5 = pnand %p2868_p1, %p2862_p0 }
  0x63   : > { %2872 = shalt.err (!%p2869_p5)
}
  0x64   : > { %2588 = dma.hbm_to_vmem [thread:$0]  (!%p3363_p2), %s4128_s5, 2048, %s3367_s29, [#allocation10], %s4093_s8, %s4093_s8, %s4094_s18  }
  0x65   : > { %s4129_s6 = sld [smem:[#allocation38_spill]] }
  0x6b   : > { %s2873_s28 = scalar_lea.hbm %s4129_s6, 2048 }
  0x6c   : > { %p2874_p9 = scmp.ne.s32.totalorder %s4129_s6, %s2873_s28  ;;  %p2880_p10 = scmp.lt.u32.totalorder %s2873_s28, %s4129_s6 }
  0x6e   : > { %p2876_p11 = pnand %p2874_p9, %p3379_p6 }
  0x70   : > { %p2877_p8 = pneg %p2876_p11 }
  0x72   : > { %p2882_p12 = pnand %p2880_p10, %p2877_p8 }
  0x74   : > { %2885 = shalt.err (!%p2882_p12)
}
  0x75   : > { %s2886_s25 = scalar_lea.vmem %s336_s7, 2048  ;;  %p2894_p1 = scmp.lt.s32.totalorder %s336_s7, %s336_s7 }
  0x76   : > { %p2887_p0 = scmp.ne.s32.totalorder %s336_s7, %s2886_s25  ;;  %p2895_p5 = scmp.lt.s32.totalorder %s2886_s25, %s2886_s25 }
  0x78   : > { %p2889_p4 = pnand %p2887_p0, %p3379_p6  ;;  %p2896_p3 = por %p2895_p5, %p2894_p1 }
  0x7a   : > { %p2890_p7 = pneg %p2889_p4 }
  0x7c   : > { %p2897_p13 = pnand %p2896_p3, %p2890_p7 }
  0x7e   : > { %2900 = shalt.err (!%p2897_p13)
}
  0x7f   : > { %2591 = dma.hbm_to_vmem [thread:$0]  (!%p3363_p2), %s4129_s6, 2048, %s336_s7, [#allocation10], %s4093_s8, %s4093_s8, %s4094_s18  }
  0x80   : > { %s42_s1 = sadd.s32 1, %s3171_s20  ;;  %s45_s24 = sadd.s32 1, %s3175_s21 }
  0x81   : > { %p43_p3 = scmp.ge.s32.totalorder %s42_s1, 2  ;;  %s54_s19 = sadd.s32 1, %s3159_s17 }
  0x82   : > { %p61_p13 = scmp.ne.s32.totalorder %s3159_s17, %s3155_s16  ;;  %p4097_p2 = scmp.eq.s32.totalorder %s3179_s22, 0 }
  0x83   : > { %s4189_s1 = smov (%p43_p3, %s42_s1), 0  ;;  %s4191_s24 = smov (!%p43_p3, %s45_s24), %s3175_s21 }
  0x84   : > { %4130 = sst [smem:[#allocation30_spill]] %s4189_s1  ;;  %s3461_s23 = ssub.s32 %s3171_s20, %s4189_s1 }
  0x85   : > { %p47_p6 = scmp.ge.s32.totalorder %s4191_s24, 2  ;;  %p130_p9 = scmp.eq.s32.totalorder %s3461_s23, 0 }
  0x86   : > { %p3467_p11 = por %p4097_p2, %p61_p13  ;;  %p4096_p8 = scmp.lt.s32.totalorder %s3179_s22, 4 }
  0x87   : > { %s4193_s24 = smov (%p47_p6, %s4191_s24), 0  ;;  %s349_s27 = sand.u32 1, %s3159_s17  }
  0x88   : > { %4132 = sst [smem:[#allocation31_spill]] %s4193_s24  ;;  %s2052_s28 = sshll.u32 %s3175_s21, 3 }
  0x89   : > { %s49_s15 = ssub.s32 %s3175_s21, %s4193_s24  ;;  %s1995_s9 = sshll.u32 %s349_s27, 5 }
  0x8a   : > { %s51_s30 = sor.u32 %s3461_s23, %s49_s15  ;;  %p219_p10 = scmp.eq.s32.totalorder %s49_s15, 0 }
  0x8b   : > { %p52_p12 = scmp.eq.s32.totalorder %s51_s30, 0  ;;  %s4133_s2 = sadd.s32 1, %s3135_s11 }
  0x8c   : > { %s3482_s25 = scalar_select %p219_p10, %s3135_s11, %s4133_s2  }
  0x8d   : > { %s3485_s29 = scalar_select %p52_p12, %s3159_s17, %s54_s19  }
  0x8e   : > { %s359_s10 = sadd.s32 %s3171_s20, %s2052_s28  ;;  %s353_s18 = scalar_lea.vmem [#allocation3], %s1995_s9 }
  0x8f   : > { %s1998_s8 = sshll.u32 %s359_s10, 7  ;;  %s362_s4 = sshll.u32 %s353_s18, 4  ;;  %s3493_s4 = int_to_ptr.vmem [resolvable:$true] %s362_s4 }
  0x90   : > { %s4134_s0 = sld [smem:[#allocation32_spill]]  ;;  %p3499_p0 = pnand %p4096_p8, %p3467_p11 }
  0x91   : > { %s390_s18 = sand.u32 1, %s3179_s22   ;;  %s3504_s28 = scalar_lea.sflag [#allocation4], %s349_s27 }
  0x92   : > { %p2903_p7 = pneg %p3499_p0 }
  0x96   : > { %s3491_s1 = scalar_lea.hbm %s4134_s0, %s1998_s8  ;;  %s2906_s7 = scalar_lea.hbm %s4134_s0, 2048 }
  0x97   : > { %s2901_s5 = scalar_lea.hbm %s3491_s1, 512  ;;  %p2907_p3 = scmp.lt.u32.totalorder %s3491_s1, %s4134_s0 }
  0x98   : > { %p2902_p4 = scmp.ne.s32.totalorder %s3491_s1, %s2901_s5  ;;  %p2908_p13 = scmp.lt.u32.totalorder %s2906_s7, %s2901_s5 }
  0x99   : > { %p2910_p11 = scmp.lt.u32.totalorder %s2901_s5, %s3491_s1 }
  0x9a   : > { %p2904_p1 = pnand %p2903_p7, %p2902_p4  ;;  %p2909_p6 = por %p2908_p13, %p2907_p3 }
  0x9c   : > { %p2905_p5 = pneg %p2904_p1  ;;  %p2911_p10 = por %p2910_p11, %p2909_p6 }
  0x9e   : > { %p2912_p12 = pnand %p2911_p10, %p2905_p5 }
  0xa0   : > { %2915 = shalt.err (!%p2912_p12)
}
  0xa1   : > { %s2916_s27 = scalar_lea.vmem %s3493_s4, 512  ;;  %s3186_s9 = smov [#allocation3]  }
  0xa2   : > { %p2917_p4 = scmp.ne.s32.totalorder %s3493_s4, %s2916_s27  ;;  %s2921_s2 = sshll.u32 %s3186_s9, 4  ;;  %s2922_s2 = int_to_ptr.vmem [resolvable:$false] %s2921_s2 }
  0xa3   : > { %s2923_s10 = scalar_lea.vmem %s2922_s2, 1024  ;;  %p2924_p2 = scmp.lt.s32.totalorder %s3493_s4, %s2922_s2 }
  0xa4   : > { %p2919_p1 = pnand %p2917_p4, %p2903_p7  ;;  %p2925_p3 = scmp.lt.s32.totalorder %s2923_s10, %s2916_s27 }
  0xa6   : > { %p2920_p8 = pneg %p2919_p1  ;;  %p2926_p13 = por %p2925_p3, %p2924_p2 }
  0xa8   : > { %p2927_p6 = pnand %p2926_p13, %p2920_p8 }
  0xaa   : > { %2930 = shalt.err (!%p2927_p6)
}
  0xab   : > { %s3187_s5 = smov 256   ;;  %s4136_s6 = smov 8  }
  0xac   : > { %s4137_s8 = smov 128   ;;  %s132_s7 = sadd.s32 1, %s3147_s14 }
  0xad   : > { %2595 = dma.hbm_to_vmem [thread:$0]  (!%p3499_p0), %s3491_s1, 512, %s3493_s4, %s3504_s28, %s3187_s5, %s4137_s8, %s4136_s6  }
  0xae   : > { %p139_p2 = scmp.ne.s32.totalorder %s3147_s14, %s3143_s13  ;;  %p4138_p8 = scmp.eq.s32.totalorder %s3179_s22, 0 }
  0xaf   : > { %s3540_s19 = scalar_select %p130_p9, %s3147_s14, %s132_s7  }
  0xb0   : > { %p141_p7 = por %p139_p2, %p4138_p8  ;;  %s392_s15 = sand.u32 1, %s3147_s14  }
  0xb1   : > { %s2053_s30 = sshll.u32 %s3171_s20, 10  ;;  %s1999_s27 = sshll.u32 %s392_s15, 6 }
  0xb2   : > { %s4139_s3 = sld [smem:[#allocation35_spill]]  ;;  %p4140_p5 = scmp.lt.s32.totalorder %s3179_s22, 4 }
  0xb3   : > { %s394_s1 = scalar_lea.vmem [#allocation6], %s1999_s27  ;;  %s3561_s28 = scalar_lea.sflag [#allocation7], %s390_s18 }
  0xb4   : > { %p3553_p0 = pnand %p4140_p5, %p141_p7  ;;  %s401_s23 = sshll.u32 %s394_s1, 4  ;;  %s3557_s23 = int_to_ptr.vmem [resolvable:$true] %s401_s23 }
  0xb6   : > { %p2933_p11 = pneg %p3553_p0 }
  0xb8   : > { %s3549_s10 = scalar_lea.hbm %s4139_s3, %s2053_s30  ;;  %s2936_s7 = scalar_lea.hbm %s4139_s3, 2048 }
  0xb9   : > { %s2931_s5 = scalar_lea.hbm %s3549_s10, 1024  ;;  %p2937_p4 = scmp.lt.u32.totalorder %s3549_s10, %s4139_s3 }
  0xba   : > { %p2932_p9 = scmp.ne.s32.totalorder %s3549_s10, %s2931_s5  ;;  %p2938_p1 = scmp.lt.u32.totalorder %s2936_s7, %s2931_s5 }
  0xbb   : > { %p2940_p13 = scmp.lt.u32.totalorder %s2931_s5, %s3549_s10 }
  0xbc   : > { %p2934_p10 = pnand %p2933_p11, %p2932_p9  ;;  %p2939_p3 = por %p2938_p1, %p2937_p4 }
  0xbe   : > { %p2935_p12 = pneg %p2934_p10  ;;  %p2941_p6 = por %p2940_p13, %p2939_p3 }
  0xc0   : > { %p2942_p2 = pnand %p2941_p6, %p2935_p12 }
  0xc2   : > { %2945 = shalt.err (!%p2942_p2)
}
  0xc3   : > { %s2946_s18 = scalar_lea.vmem %s3557_s23, 1024  ;;  %s3188_s27 = smov [#allocation6]  }
  0xc4   : > { %p2947_p8 = scmp.ne.s32.totalorder %s3557_s23, %s2946_s18  ;;  %s2951_s9 = sshll.u32 %s3188_s27, 4  ;;  %s2952_s9 = int_to_ptr.vmem [resolvable:$false] %s2951_s9 }
  0xc5   : > { %s2953_s2 = scalar_lea.vmem %s2952_s9, 2048  ;;  %p2954_p9 = scmp.lt.s32.totalorder %s3557_s23, %s2952_s9 }
  0xc6   : > { %p2949_p7 = pnand %p2947_p8, %p2933_p11  ;;  %p2955_p10 = scmp.lt.s32.totalorder %s2953_s2, %s2946_s18 }
  0xc8   : > { %p2950_p5 = pneg %p2949_p7  ;;  %p2956_p4 = por %p2955_p10, %p2954_p9 }
  0xca   : > { %p2957_p1 = pnand %p2956_p4, %p2950_p5 }
  0xcc   : > { %2960 = shalt.err (!%p2957_p1)
}
  0xcd   : > { %s3189_s1 = smov 64   ;;  %s3190_s5 = smov 4  }
  0xce   : > { %2598 = dma.hbm_to_vmem [thread:$0]  (!%p3553_p0), %s3549_s10, 1024, %s3557_s23, %s3561_s28, %s3189_s1, %s3189_s1, %s3190_s5  }
  0xcf   : > { %p4142_p11 = scmp.ne.s32.totalorder %s4124_s12, 0 }
  0xd0   : > { %s415_s6 = sand.u32 (!%p4142_p11), 1, %s3155_s16   ;;  %p4143_p12 = scmp.ne.s32.totalorder (!%p4142_p11), %s4117_s26, 0 }
  0xd1   : > { %413 = sbr.rel (%p4142_p11) target bundleno = 1350 (0x546), region = 48  ;;  %s2003_s8 = sshll.u32 (!%p4142_p11), %s415_s6, 5 }
  0xd2   : > { %s416_s7 = scalar_lea.sflag (!%p4142_p11), [#allocation4], %s415_s6  ;;  %s3592_s15 = scalar_lea.vmem (!%p4142_p11), [#allocation3], %s2003_s8 }
  0xd8   : > { %3102 = dma.done.wait (%p4143_p12), %s416_s7, 512  }
  0xd9   : > { %3104 = vsyncadd (%p4143_p12), %s416_s7, 4294966784  ;;  %s4144_s30 = sld [smem:[#allocation26_spill]]  ;;  %s4145_s4 = sld [smem:[#allocation27_spill]] }
  0xda   : > { %s426_s23 = sand.u32 1, %s3143_s13  }
  0xdb   : > { %s2004_s12 = sshll.u32 %s426_s23, 6 }
  0xdc   : > { %s3602_s18 = scalar_lea.vmem [#allocation6], %s2004_s12 }
  0xdf   : > { %s4098_s10 = sand.u32 1, %s4144_s30   ;;  %p4146_p0 = scmp.ne.s32.totalorder %s4145_s4, 0 }
  0xe0   : > { %s425_s28 = scalar_lea.sflag [#allocation7], %s4098_s10 }
  0xe1   : > { %3106 = dma.done.wait (%p4146_p0), %s425_s28, 1024  }
  0xe2   : > { %3108 = vsyncadd (%p4146_p0), %s425_s28, 4294966272  ;;  %p4147_p3 = scmp.eq.s32.totalorder %s4144_s30, 0 }
  0xe4   : > { %3110 = dma.done.wait (%p4147_p3), [#allocation7], 2048   ;;  %p4148_p13 = pmov %p4147_p3 }
  0xe5   : > { %p4149_p6 = pmov %p4147_p3 }
  0xe6   : > { %3112 = vsyncadd (%p4148_p13), [#allocation7], 4294965248 }
  0xe7   : > { %3114 = dma.done.wait (%p4149_p6), [#allocation10], 4096   ;;  %p4150_p2 = pmov %p4147_p3 }
  0xe8   : > { %s4151_s26 = sld [smem:[#allocation23_spill]]  ;;  %s4152_s27 = sld [smem:[#allocation25_spill]] }
  0xe9   : > { %3116 = vsyncadd (%p4150_p2), [#allocation10], 4294963200  ;;  %s4153_s4 = sld [smem:[#allocation33_spill]]  ;;  %s4154_s28 = sld [smem:[#allocation34_spill]] }
  0xea   : > { %s4155_s3 = sld [smem:[#allocation24_spill]] }
  0xee   : > { %s3617_s9 = sand.u32 1, %s4151_s26   ;;  %s2011_s2 = sshll.u32 %s4152_s27, 4 }
  0xef   : > { %s2008_s1 = sshll.u32 %s3617_s9, 7  ;;  %s2010_s5 = sshll.u32 %s3617_s9, 6 }
  0xf0   : > { %p502_p8 = scmp.lt.s32.totalorder %s2011_s2, 31  ;;  %s3632_s26 = scalar_lea.vmem [#allocation12], %s2008_s1 }
  0xf1   : > { %s3634_s0 = scalar_lea.vmem [#allocation13], %s2008_s1  ;;  %s3636_s27 = scalar_lea.vmem [#allocation15], %s2010_s5 }
  0xf2   : > { %s4195_s2 = smov (!%p502_p8, %s2011_s2), 31  ;;  %p2015_p7 = scmp.ne.s32.totalorder %s4155_s3, 0 }
  0xf3   : > { %s2012_s6 = sshll.u32 %s4195_s2, 3  ;;  %v3191_v0 = vmov (!%p2015_p7), 0.0  }
  0xf4   : > { %s3625_s23 = scalar_lea.vmem %s4153_s4, %s2012_s6  ;;  %s3630_s10 = scalar_lea.vmem %s4154_s28, %s2012_s6  ;;  %522 = vst [vmem:[#allocation2] sm:$0xff] (!%p2015_p7), %v3191_v0  ;;  %523 = vst [vmem:[#allocation2 + $0x8] sm:$0xff] (!%p2015_p7), %v3191_v0 }
  0xf5   : > { %521 = sbr.rel (%p2015_p7) target bundleno = 252 (0xfc), region = 72  ;;  %524 = vst [vmem:[#allocation2 + $0x10] sm:$0xff] (!%p2015_p7), %v3191_v0  ;;  %525 = vst [vmem:[#allocation2 + $0x18] sm:$0xff] (!%p2015_p7), %v3191_v0 }
  0xf6   : > { %526 = vst [vmem:[#allocation2 + $0x20] sm:$0xff] (!%p2015_p7), %v3191_v0  ;;  %527 = vst [vmem:[#allocation2 + $0x28] sm:$0xff] (!%p2015_p7), %v3191_v0 }
  0xf7   : > { %528 = vst [vmem:[#allocation2 + $0x30] sm:$0xff] (!%p2015_p7), %v3191_v0  ;;  %529 = vst [vmem:[#allocation2 + $0x38] sm:$0xff] (!%p2015_p7), %v3191_v0 }
  0xf8   : > { %530 = vst [vmem:[#allocation2 + $0x40] sm:$0xff] (!%p2015_p7), %v3191_v0  ;;  %531 = vst [vmem:[#allocation2 + $0x48] sm:$0xff] (!%p2015_p7), %v3191_v0 }
  0xf9   : > { %532 = vst [vmem:[#allocation2 + $0x50] sm:$0xff] (!%p2015_p7), %v3191_v0  ;;  %533 = vst [vmem:[#allocation2 + $0x58] sm:$0xff] (!%p2015_p7), %v3191_v0 }
  0xfa   : > { %534 = vst [vmem:[#allocation2 + $0x60] sm:$0xff] (!%p2015_p7), %v3191_v0  ;;  %535 = vst [vmem:[#allocation2 + $0x68] sm:$0xff] (!%p2015_p7), %v3191_v0 }
  0xfb   : > { %536 = vst [vmem:[#allocation2 + $0x70] sm:$0xff] (!%p2015_p7), %v3191_v0  ;;  %537 = vst [vmem:[#allocation2 + $0x78] sm:$0xff] (!%p2015_p7), %v3191_v0 }
  0xfc PF: > { %v2743_v1 = vld [vmem:[%s3602_s18] sm:$0xff]   ;;  %v2744_v2 = vld [vmem:[%s3602_s18 + $0x8] sm:$0xff]   ;;  %v2745_v3 = vld [vmem:[%s3602_s18 + $0x10] sm:$0xff]   ;;  %s4156_s3 = sld [smem:[#allocation24_spill]] }
  0xfd   : > { %2232 = vmatprep.subr.bf16.mxu0 %v2743_v1  ;;  %2528 = vmatprep.subr.bf16.mxu1 %v2743_v1  ;;  %v2746_v4 = vld [vmem:[%s3602_s18 + $0x18] sm:$0xff]   ;;  %v554_v5 = vld [vmem:[%s3592_s15] sm:$0xff]  ;;  %v556_v6 = vld [vmem:[%s3592_s15 + $0x10] sm:$0xff] }
  0xfe   : > { %2233 = vmatpush3.bf16.msra.mxu0 %v2743_v1  ;;  %2536 = vmatpush3.bf16.msra.mxu1 %v2743_v1  ;;  %v558_v7 = vunpack.c.l.s8.bf16 %v554_v5  ;;  %v562_v8 = vunpack.c.l.s8.bf16 %v556_v6  ;;  %v2747_v9 = vld [vmem:[%s3602_s18 + $0x20] sm:$0xff]   ;;  %v2748_v10 = vld [vmem:[%s3602_s18 + $0x28] sm:$0xff]   ;;  %v2749_v11 = vld [vmem:[%s3602_s18 + $0x30] sm:$0xff]   ;;  %v559_v15 = vunpack.c.h.s8.bf16 %v554_v5  ;;  %v563_v16 = vunpack.c.h.s8.bf16 %v556_v6 }
  0xff   : > { %2234 = vmatprep.subr.bf16.mxu0 %v2744_v2  ;;  %2529 = vmatprep.subr.bf16.mxu1 %v2744_v2  ;;  %v2750_v12 = vld [vmem:[%s3602_s18 + $0x38] sm:$0xff]   ;;  %v555_v13 = vld [vmem:[%s3592_s15 + $0x8] sm:$0xff]  ;;  %v540_v21 = vld [vmem:[#allocation2 + $0x10] sm:$0xff] }
 0x100   : > { %2248 = vmatprep.mubr.bf16.mxu0 %v558_v7  ;;  %2256 = vmatprep.mubr.bf16.mxu1 %v562_v8  ;;  %v557_v14 = vld [vmem:[%s3592_s15 + $0x18] sm:$0xff]  ;;  %v560_v17 = vunpack.c.l.s8.bf16 %v555_v13  ;;  %v561_v19 = vunpack.c.h.s8.bf16 %v555_v13  ;;  %v548_v22 = vld [vmem:[#allocation2 + $0x50] sm:$0xff]  ;;  %v538_v23 = vld [vmem:[#allocation2] sm:$0xff] }
 0x101   : > { %v564_v18 = vunpack.c.l.s8.bf16 %v557_v14  ;;  %v565_v20 = vunpack.c.h.s8.bf16 %v557_v14  ;;  %v546_v24 = vld [vmem:[#allocation2 + $0x40] sm:$0xff]  ;;  %v541_v27 = vld [vmem:[#allocation2 + $0x18] sm:$0xff]  ;;  %v539_v33 = vld [vmem:[#allocation2 + $0x8] sm:$0xff] }
 0x102   : > { %2235 = vmatpush3.bf16.msra.mxu0 %v2744_v2  ;;  %2537 = vmatpush3.bf16.msra.mxu1 %v2744_v2  ;;  %v549_v28 = vld [vmem:[#allocation2 + $0x58] sm:$0xff]  ;;  %v547_v34 = vld [vmem:[#allocation2 + $0x48] sm:$0xff]  ;;  %v544_v45 = vld [vmem:[#allocation2 + $0x30] sm:$0xff]  ;;  %p2024_p5 = scmp.ne.s32.totalorder %s4156_s3, 1 }
 0x103   : > { %2236 = vmatprep.subr.bf16.mxu0 %v2745_v3  ;;  %2530 = vmatprep.subr.bf16.mxu1 %v2745_v3  ;;  %v552_v46 = vld [vmem:[#allocation2 + $0x70] sm:$0xff]  ;;  %v542_v47 = vld [vmem:[#allocation2 + $0x20] sm:$0xff]  ;;  %v545_v51 = vld [vmem:[#allocation2 + $0x38] sm:$0xff]  ;;  %v3192_v7 = vmov (!%p2024_p5), 0  }
 0x104   : > { %v550_v48 = vld [vmem:[#allocation2 + $0x60] sm:$0xff]  ;;  %v553_v52 = vld [vmem:[#allocation2 + $0x78] sm:$0xff]  ;;  %v543_v57 = vld [vmem:[#allocation2 + $0x28] sm:$0xff]  ;;  %2752 = vset.pattern.permute.xlu1 (!%p2024_p5), %v3192_v7  ;;  %2751 = vset.pattern.permute.xlu0 (!%p2024_p5), %v3192_v7 }
 0x105   : > { %v551_v58 = vld [vmem:[#allocation2 + $0x68] sm:$0xff]  ;;  %v781_v5 = vld [vmem:[%s3630_s10 + $0x10] sm:$0xff] (!%p2024_p5)  ;;  %v779_v6 = vld [vmem:[%s3630_s10] sm:$0xff] (!%p2024_p5) }
 0x106   : > { %2237 = vmatpush3.bf16.msra.mxu0 %v2745_v3  ;;  %2538 = vmatpush3.bf16.msra.mxu1 %v2745_v3  ;;  %v782_v8 = vld [vmem:[%s3630_s10 + $0x18] sm:$0xff] (!%p2024_p5)  ;;  %v925_v13 = vld [vmem:[#allocation9 + $0x10] sm:$0xff] (!%p2024_p5) }
 0x107   : > { %2238 = vmatprep.subr.bf16.mxu0 %v2746_v4  ;;  %2531 = vmatprep.subr.bf16.mxu1 %v2746_v4  ;;  %v926_v14 = vld [vmem:[#allocation9 + $0x18] sm:$0xff] (!%p2024_p5) }
 0x108   : > { %807 = vperm.xlu1 (!%p2024_p5), %2752, %v781_v5   ;;  %797 = vperm.xlu0 (!%p2024_p5), %2751, %v779_v6  }
 0x10a   : > { %2239 = vmatpush3.bf16.msra.mxu0 %v2746_v4  ;;  %2539 = vmatpush3.bf16.msra.mxu1 %v2746_v4 }
 0x10b   : > { %2240 = vmatprep.subr.bf16.mxu0 %v2747_v9  ;;  %2532 = vmatprep.subr.bf16.mxu1 %v2747_v9 }
 0x10c   : > { %812 = vperm.xlu1 (!%p2024_p5), %2752, %v782_v8  }
 0x10e   : > { %2241 = vmatpush3.bf16.msra.mxu0 %v2747_v9  ;;  %2540 = vmatpush3.bf16.msra.mxu1 %v2747_v9  ;;  %v780_v9 = vld [vmem:[%s3630_s10 + $0x8] sm:$0xff] (!%p2024_p5) }
 0x10f   : > { %2242 = vmatprep.subr.bf16.mxu0 %v2748_v10  ;;  %2533 = vmatprep.subr.bf16.mxu1 %v2748_v10 }
 0x110   : > { %802 = vperm.xlu0 (!%p2024_p5), %2751, %v780_v9   ;;  %v913_v9 = vld [vmem:[#allocation8 + $0x30] sm:$0xff] (!%p2024_p5) }
 0x112   : > { %2243 = vmatpush3.bf16.msra.mxu0 %v2748_v10  ;;  %2541 = vmatpush3.bf16.msra.mxu1 %v2748_v10  ;;  %v923_v10 = vld [vmem:[#allocation9] sm:$0xff] (!%p2024_p5) }
 0x113   : > { %2244 = vmatprep.subr.bf16.mxu0 %v2749_v11  ;;  %2534 = vmatprep.subr.bf16.mxu1 %v2749_v11 }
 0x116   : > { %2245 = vmatpush3.bf16.msra.mxu0 %v2749_v11  ;;  %2542 = vmatpush3.bf16.msra.mxu1 %v2749_v11  ;;  %v924_v11 = vld [vmem:[#allocation9 + $0x8] sm:$0xff] (!%p2024_p5) }
 0x117   : > { %2246 = vmatprep.subr.bf16.mxu0 %v2750_v12  ;;  %2535 = vmatprep.subr.bf16.mxu1 %v2750_v12 }
 0x11a   : > { %2247 = vmatpush3.bf16.msra.mxu0 %v2750_v12  ;;  %2543 = vmatpush3.bf16.msra.mxu1 %v2750_v12  ;;  %v2432_v12 = vpack.c.bf16 (!%p2024_p5), %v924_v11, %v923_v10  ;;  %v914_v10 = vld [vmem:[#allocation8 + $0x38] sm:$0xff] (!%p2024_p5) }
 0x11c   : > { %2433 = vmatprep.subr.bf16.mxu0 (!%p2024_p5), %v2432_v12 }
 0x11d   : > { %2249 = vmatmul.mubr.bf16.vlgmr.msra.gmra.mrb[0].mxu0 %v559_v15  ;;  %2257 = vmatmul.mubr.bf16.vlgmr.msra.gmra.mrb[0].mxu1 %v563_v16  ;;  %v784_v15 = vld [vmem:[%s3630_s10 + $0x28] sm:$0xff] (!%p2024_p5)  ;;  %v783_v16 = vld [vmem:[%s3630_s10 + $0x20] sm:$0xff] (!%p2024_p5) }
 0x11e   : > { %2252 = vmatprep.mubr.bf16.mxu0 %v560_v17  ;;  %2260 = vmatprep.mubr.bf16.mxu1 %v564_v18  ;;  %v2436_v17 = vpack.c.bf16 (!%p2024_p5), %v926_v14, %v925_v13  ;;  %v927_v18 = vld [vmem:[#allocation9 + $0x20] sm:$0xff] (!%p2024_p5) }
 0x11f   : > { %2435 = vmatpush3.bf16.msra.mxu0 (!%p2024_p5), %v2432_v12  ;;  %822 = vperm.xlu1 (!%p2024_p5), %2752, %v784_v15  }
 0x120   : > { %817 = vperm.xlu0 (!%p2024_p5), %2751, %v783_v16   ;;  %2437 = vmatprep.subr.bf16.mxu0 (!%p2024_p5), %v2436_v17  ;;  %v2476_v16 = vpack.c.bf16 (!%p2024_p5), %v914_v10, %v913_v9  ;;  %v1472_v10 = vld [vmem:[#allocation11 + $0x18] sm:$0xff] (!%p2024_p5) }
 0x123   : > { %2439 = vmatpush3.bf16.msra.mxu0 (!%p2024_p5), %v2436_v17 }
 0x125   : > { %2253 = vmatmul.mubr.bf16.gmra.mrb[4].mxu0 %v561_v19  ;;  %2261 = vmatmul.mubr.bf16.gmra.mrb[4].mxu1 %v565_v20  ;;  %v928_v19 = vld [vmem:[#allocation9 + $0x28] sm:$0xff] (!%p2024_p5)  ;;  %v786_v20 = vld [vmem:[%s3630_s10 + $0x38] sm:$0xff] (!%p2024_p5) }
 0x126   : > { %832 = vperm.xlu1 (!%p2024_p5), %2752, %v786_v20  }
 0x1f0   : > { %v2250_v25 = vpop.f32.mrb[0].mxu0  ;;  %v2258_v26 = vpop.f32.mrb[0].mxu1 }
 0x1f1   : > { %v729_v29 = vadd.f32 %v2250_v25, %v540_v21  ;;  %v737_v30 = vadd.f32 %v2258_v26, %v548_v22  ;;  %v664_v31 = vpop.f32.mrb[1].mxu0  ;;  %v696_v32 = vpop.f32.mrb[1].mxu1  ;;  %v785_v21 = vld [vmem:[%s3630_s10 + $0x30] sm:$0xff] (!%p2024_p5)  ;;  %v2440_v22 = vpack.c.bf16 (!%p2024_p5), %v928_v19, %v927_v18  ;;  %v788_v25 = vld [vmem:[%s3630_s10 + $0x48] sm:$0xff] (!%p2024_p5)  ;;  %v787_v26 = vld [vmem:[%s3630_s10 + $0x40] sm:$0xff] (!%p2024_p5) }
 0x1f2   : > { %v727_v35 = vadd.f32 %v664_v31, %v538_v23  ;;  %v735_v36 = vadd.f32 %v696_v32, %v546_v24  ;;  %v2251_v37 = vpop.f32.mrb[2].mxu0  ;;  %v2259_v38 = vpop.f32.mrb[2].mxu1  ;;  %v929_v23 = vld [vmem:[#allocation9 + $0x30] sm:$0xff] (!%p2024_p5)  ;;  %v930_v24 = vld [vmem:[#allocation9 + $0x38] sm:$0xff] (!%p2024_p5)  ;;  %827 = vperm.xlu0 (!%p2024_p5), %2751, %v785_v21   ;;  %842 = vperm.xlu1 (!%p2024_p5), %2752, %v788_v25   ;;  %v915_v18 = vld [vmem:[#allocation8 + $0x40] sm:$0xff] (!%p2024_p5) }
 0x1f3   : > { %745 = vst [vmem:[#allocation2 + $0x10] sm:$0xff] %v729_v29  ;;  %753 = vst [vmem:[#allocation2 + $0x50] sm:$0xff] %v737_v30  ;;  %v730_v39 = vadd.f32 %v2251_v37, %v541_v27  ;;  %v738_v40 = vadd.f32 %v2259_v38, %v549_v28  ;;  %v667_v41 = vpop.f32.mrb[3].mxu0  ;;  %v699_v42 = vpop.f32.mrb[3].mxu1  ;;  %2441 = vmatprep.subr.bf16.mxu0 (!%p2024_p5), %v2440_v22  ;;  %v2444_v27 = vpack.c.bf16 (!%p2024_p5), %v930_v24, %v929_v23  ;;  %v931_v28 = vld [vmem:[#allocation9 + $0x40] sm:$0xff] (!%p2024_p5)  ;;  %v932_v29 = vld [vmem:[#allocation9 + $0x48] sm:$0xff] (!%p2024_p5) }
 0x1f4   : > { %743 = vst [vmem:[#allocation2] sm:$0xff] %v727_v35  ;;  %751 = vst [vmem:[#allocation2 + $0x40] sm:$0xff] %v735_v36  ;;  %v728_v43 = vadd.f32 %v667_v41, %v539_v33  ;;  %v736_v44 = vadd.f32 %v699_v42, %v547_v34  ;;  %2443 = vmatpush3.bf16.msra.mxu0 (!%p2024_p5), %v2440_v22  ;;  %v790_v30 = vld [vmem:[%s3630_s10 + $0x58] sm:$0xff] (!%p2024_p5)  ;;  %v789_v31 = vld [vmem:[%s3630_s10 + $0x50] sm:$0xff] (!%p2024_p5)  ;;  %v2448_v32 = vpack.c.bf16 (!%p2024_p5), %v932_v29, %v931_v28 }
 0x1f5   : > { %746 = vst [vmem:[#allocation2 + $0x18] sm:$0xff] %v730_v39  ;;  %754 = vst [vmem:[#allocation2 + $0x58] sm:$0xff] %v738_v40  ;;  %2445 = vmatprep.subr.bf16.mxu0 (!%p2024_p5), %v2444_v27  ;;  %v933_v33 = vld [vmem:[#allocation9 + $0x50] sm:$0xff] (!%p2024_p5)  ;;  %v934_v34 = vld [vmem:[#allocation9 + $0x58] sm:$0xff] (!%p2024_p5) }
 0x1f6   : > { %744 = vst [vmem:[#allocation2 + $0x8] sm:$0xff] %v728_v43  ;;  %752 = vst [vmem:[#allocation2 + $0x48] sm:$0xff] %v736_v44  ;;  %837 = vperm.xlu0 (!%p2024_p5), %2751, %v787_v26   ;;  %852 = vperm.xlu1 (!%p2024_p5), %2752, %v790_v30   ;;  %v792_v35 = vld [vmem:[%s3630_s10 + $0x68] sm:$0xff] (!%p2024_p5)  ;;  %v791_v36 = vld [vmem:[%s3630_s10 + $0x60] sm:$0xff] (!%p2024_p5)  ;;  %v2452_v37 = vpack.c.bf16 (!%p2024_p5), %v934_v34, %v933_v33 }
 0x1f7   : > { %v935_v38 = vld [vmem:[#allocation9 + $0x60] sm:$0xff] (!%p2024_p5)  ;;  %v936_v39 = vld [vmem:[#allocation9 + $0x68] sm:$0xff] (!%p2024_p5)  ;;  %v794_v40 = vld [vmem:[%s3630_s10 + $0x78] sm:$0xff] (!%p2024_p5) }
 0x1f8   : > { %v2254_v49 = vpop.f32.mrb[4].mxu0  ;;  %v2262_v50 = vpop.f32.mrb[4].mxu1  ;;  %762 = sbr.rel (%p2024_p5) target bundleno = 1271 (0x4f7), region = 76  ;;  %2447 = vmatpush3.bf16.msra.mxu0 (!%p2024_p5), %v2444_v27  ;;  %v793_v41 = vld [vmem:[%s3630_s10 + $0x70] sm:$0xff] (!%p2024_p5)  ;;  %v2456_v42 = vpack.c.bf16 (!%p2024_p5), %v936_v39, %v935_v38  ;;  %v938_v44 = vld [vmem:[#allocation9 + $0x78] sm:$0xff] (!%p2024_p5)  ;;  %v916_v19 = vld [vmem:[#allocation8 + $0x48] sm:$0xff] (!%p2024_p5) }
 0x1f9   : > { %v733_v53 = vadd.f32 %v2254_v49, %v544_v45  ;;  %v741_v54 = vadd.f32 %v2262_v50, %v552_v46  ;;  %v680_v55 = vpop.f32.mrb[5].mxu0  ;;  %v712_v56 = vpop.f32.mrb[5].mxu1  ;;  %2449 = vmatprep.subr.bf16.mxu0 (!%p2024_p5), %v2448_v32  ;;  %v937_v43 = vld [vmem:[#allocation9 + $0x70] sm:$0xff] (!%p2024_p5)  ;;  %v907_v46 = vld [vmem:[#allocation8] sm:$0xff] (!%p2024_p5)  ;;  %v2480_v25 = vpack.c.bf16 (!%p2024_p5), %v916_v19, %v915_v18  ;;  %v918_v28 = vld [vmem:[#allocation8 + $0x58] sm:$0xff] (!%p2024_p5) }
 0x1fa   : > { %v731_v59 = vadd.f32 %v680_v55, %v542_v47  ;;  %v739_v60 = vadd.f32 %v712_v56, %v550_v48  ;;  %v2255_v61 = vpop.f32.mrb[6].mxu0  ;;  %v2263_v62 = vpop.f32.mrb[6].mxu1  ;;  %847 = vperm.xlu0 (!%p2024_p5), %2751, %v789_v31   ;;  %862 = vperm.xlu1 (!%p2024_p5), %2752, %v792_v35   ;;  %v2460_v45 = vpack.c.bf16 (!%p2024_p5), %v938_v44, %v937_v43  ;;  %v908_v47 = vld [vmem:[#allocation8 + $0x8] sm:$0xff] (!%p2024_p5)  ;;  %v909_v55 = vld [vmem:[#allocation8 + $0x10] sm:$0xff] (!%p2024_p5)  ;;  %v910_v56 = vld [vmem:[#allocation8 + $0x18] sm:$0xff] (!%p2024_p5) }
 0x1fb   : > { %749 = vst [vmem:[#allocation2 + $0x30] sm:$0xff] %v733_v53  ;;  %757 = vst [vmem:[#allocation2 + $0x70] sm:$0xff] %v741_v54  ;;  %v734_v63 = vadd.f32 %v2255_v61, %v545_v51  ;;  %v742_v0 = vadd.f32 %v2263_v62, %v553_v52  ;;  %v683_v1 = vpop.f32.mrb[7].mxu0  ;;  %v715_v2 = vpop.f32.mrb[7].mxu1  ;;  %v2464_v48 = vpack.c.bf16 (!%p2024_p5), %v908_v47, %v907_v46  ;;  %v763_v49 = vld [vmem:[#allocation2] sm:$0xff] (!%p2024_p5)  ;;  %v765_v52 = vld [vmem:[#allocation2 + $0x10] sm:$0xff] (!%p2024_p5) }
 0x1fc   : > { %747 = vst [vmem:[#allocation2 + $0x20] sm:$0xff] %v731_v59  ;;  %755 = vst [vmem:[#allocation2 + $0x60] sm:$0xff] %v739_v60  ;;  %v732_v3 = vadd.f32 %v683_v1, %v543_v57  ;;  %v740_v4 = vadd.f32 %v715_v2, %v551_v58  ;;  %2451 = vmatpush3.bf16.msra.mxu0 (!%p2024_p5), %v2448_v32  ;;  %v808_v50 = vpop.permute.xlu1 (!%p2024_p5), %807  ;;  %v798_v51 = vpop.permute.xlu0 (!%p2024_p5), %797  ;;  %v766_v60 = vld [vmem:[#allocation2 + $0x18] sm:$0xff] (!%p2024_p5)  ;;  %v2468_v62 = vpack.c.bf16 (!%p2024_p5), %v910_v56, %v909_v55  ;;  %v912_v1 = vld [vmem:[#allocation8 + $0x28] sm:$0xff] (!%p2024_p5) }
 0x1fd   : > { %750 = vst [vmem:[#allocation2 + $0x38] sm:$0xff] %v734_v63  ;;  %758 = vst [vmem:[#allocation2 + $0x78] sm:$0xff] %v742_v0  ;;  %2453 = vmatprep.subr.bf16.mxu0 (!%p2024_p5), %v2452_v37  ;;  %v875_v53 = vmul.f32 (!%p2024_p5), %v798_v51, %v763_v49  ;;  %v764_v54 = vld [vmem:[#allocation2 + $0x8] sm:$0xff] (!%p2024_p5)  ;;  %v877_v57 = vmul.f32 (!%p2024_p5), %v808_v50, %v765_v52  ;;  %v911_v0 = vld [vmem:[#allocation8 + $0x20] sm:$0xff] (!%p2024_p5) }
 0x1fe   : > { %748 = vst [vmem:[#allocation2 + $0x28] sm:$0xff] %v732_v3  ;;  %756 = vst [vmem:[#allocation2 + $0x68] sm:$0xff] %v740_v4  ;;  %857 = vperm.xlu0 (!%p2024_p5), %2751, %v791_v36   ;;  %872 = vperm.xlu1 (!%p2024_p5), %2752, %v794_v40   ;;  %v2472_v7 = vpack.c.bf16 (!%p2024_p5), %v912_v1, %v911_v0  ;;  %v771_v17 = vld [vmem:[#allocation2 + $0x40] sm:$0xff] (!%p2024_p5)  ;;  %v772_v23 = vld [vmem:[#allocation2 + $0x48] sm:$0xff] (!%p2024_p5) }
 0x1ff   : > { %2296 = vmatprep.mubr.f32.mxu0 %v875_v53  ;;  %v773_v26 = vld [vmem:[#allocation2 + $0x50] sm:$0xff]  ;;  %v774_v32 = vld [vmem:[#allocation2 + $0x58] sm:$0xff]  ;;  %v919_v36 = vld [vmem:[#allocation8 + $0x60] sm:$0xff] }
 0x200   : > { %2455 = vmatpush3.bf16.msra.mxu0 %v2452_v37  ;;  %v813_v58 = vpop.permute.xlu1 %812  ;;  %v803_v59 = vpop.permute.xlu0 %802  ;;  %v917_v27 = vld [vmem:[#allocation8 + $0x50] sm:$0xff]  ;;  %v920_v37 = vld [vmem:[#allocation8 + $0x68] sm:$0xff]  ;;  %v922_v46 = vld [vmem:[#allocation8 + $0x78] sm:$0xff] }
 0x201   : > { %2457 = vmatprep.subr.bf16.mxu0 %v2456_v42  ;;  %v876_v61 = vmul.f32 %v803_v59, %v764_v54  ;;  %v878_v4 = vmul.f32 %v813_v58, %v766_v60  ;;  %v2484_v34 = vpack.c.bf16 %v918_v28, %v917_v27  ;;  %v2488_v43 = vpack.c.bf16 %v920_v37, %v919_v36  ;;  %v891_v54 = vld [vmem:[%s3625_s23] sm:$0xff]  ;;  %v892_v55 = vld [vmem:[%s3625_s23 + $0x8] sm:$0xff]  ;;  %v893_v56 = vld [vmem:[%s3625_s23 + $0x10] sm:$0xff] }
 0x202   : > { %867 = vperm.xlu0 %2751, %v793_v41   ;;  %v769_v8 = vld [vmem:[#allocation2 + $0x30] sm:$0xff]  ;;  %v895_v58 = vld [vmem:[%s3625_s23 + $0x20] sm:$0xff]  ;;  %v896_v59 = vld [vmem:[%s3625_s23 + $0x28] sm:$0xff] }
 0x203   : > { %v767_v63 = vld [vmem:[#allocation2 + $0x20] sm:$0xff]  ;;  %v777_v44 = vld [vmem:[#allocation2 + $0x70] sm:$0xff]  ;;  %v902_v1 = vld [vmem:[%s3625_s23 + $0x58] sm:$0xff] }
 0x204   : > { %2459 = vmatpush3.bf16.msra.mxu0 %v2456_v42  ;;  %v823_v2 = vpop.permute.xlu1 %822  ;;  %v818_v3 = vpop.permute.xlu0 %817  ;;  %v770_v14 = vld [vmem:[#allocation2 + $0x38] sm:$0xff]  ;;  %v775_v35 = vld [vmem:[#allocation2 + $0x60] sm:$0xff]  ;;  %v897_v60 = vld [vmem:[%s3625_s23 + $0x30] sm:$0xff] }
 0x205   : > { %2461 = vmatprep.subr.bf16.mxu0 %v2460_v45  ;;  %v768_v5 = vld [vmem:[#allocation2 + $0x28] sm:$0xff]  ;;  %v879_v6 = vmul.f32 %v818_v3, %v767_v63  ;;  %v778_v52 = vld [vmem:[#allocation2 + $0x78] sm:$0xff]  ;;  %v901_v0 = vld [vmem:[%s3625_s23 + $0x50] sm:$0xff] }
 0x206   : > { %v880_v13 = vmul.f32 %v823_v2, %v768_v5  ;;  %v776_v41 = vld [vmem:[#allocation2 + $0x68] sm:$0xff]  ;;  %v903_v2 = vld [vmem:[%s3625_s23 + $0x60] sm:$0xff]  ;;  %v906_v5 = vld [vmem:[%s3625_s23 + $0x78] sm:$0xff] }
 0x207   : > { %v900_v63 = vld [vmem:[%s3625_s23 + $0x48] sm:$0xff] }
 0x208   : > { %2463 = vmatpush3.bf16.msra.mxu0 %v2460_v45  ;;  %v833_v11 = vpop.permute.xlu1 %832  ;;  %v921_v45 = vld [vmem:[#allocation8 + $0x70] sm:$0xff]  ;;  %v904_v3 = vld [vmem:[%s3625_s23 + $0x68] sm:$0xff] }
 0x209   : > { %2465 = vmatprep.subr.bf16.mxu0 %v2464_v48  ;;  %v882_v22 = vmul.f32 %v833_v11, %v770_v14  ;;  %v2492_v50 = vpack.c.bf16 %v922_v46, %v921_v45 }
 0x20b   : > { %2297 = vmatmul.mubr.f32.vlgmr.msra.gmra.mrb[0].mxu0 %v876_v61  ;;  %v898_v61 = vld [vmem:[%s3625_s23 + $0x38] sm:$0xff] }
 0x20c   : > { %2467 = vmatpush3.bf16.msra.mxu0 %v2464_v48  ;;  %2299 = vmatprep.mubr.f32.mxu0 %v877_v57  ;;  %v894_v57 = vld [vmem:[%s3625_s23 + $0x18] sm:$0xff] }
 0x20d   : > { %2469 = vmatprep.subr.bf16.mxu0 %v2468_v62 }
 0x20f   : > { %2300 = vmatmul.mubr.f32.gmra.mrb[2].mxu0 %v878_v4  ;;  %v905_v4 = vld [vmem:[%s3625_s23 + $0x70] sm:$0xff] }
 0x210   : > { %2471 = vmatpush3.bf16.msra.mxu0 %v2468_v62  ;;  %2302 = vmatprep.mubr.f32.mxu0 %v879_v6  ;;  %v899_v62 = vld [vmem:[%s3625_s23 + $0x40] sm:$0xff] }
 0x211   : > { %2473 = vmatprep.subr.bf16.mxu0 %v2472_v7  ;;  %v1469_v6 = vld [vmem:[#allocation11] sm:$0xff] }
 0x213   : > { %2303 = vmatmul.mubr.f32.gmra.mrb[4].mxu0 %v880_v13  ;;  %v1474_v13 = vld [vmem:[#allocation11 + $0x28] sm:$0xff] }
 0x214   : > { %2475 = vmatpush3.bf16.msra.mxu0 %v2472_v7  ;;  %v1470_v7 = vld [vmem:[#allocation11 + $0x8] sm:$0xff] }
 0x215   : > { %2477 = vmatprep.subr.bf16.mxu0 %v2476_v16  ;;  %v2496_v9 = vpack.c.bf16 %v1470_v7, %v1469_v6  ;;  %v1483_v7 = vld [vmem:[#allocation11 + $0x70] sm:$0xff] }
 0x217   : > { %2497 = vmatprep.subr.bf16.mxu1 %v2496_v9 }
 0x218   : > { %2479 = vmatpush3.bf16.msra.mxu0 %v2476_v16  ;;  %2499 = vmatpush3.bf16.msra.mxu1 %v2496_v9  ;;  %v1476_v16 = vld [vmem:[#allocation11 + $0x38] sm:$0xff] }
 0x219   : > { %2481 = vmatprep.subr.bf16.mxu0 %v2480_v25 }
 0x21c   : > { %2483 = vmatpush3.bf16.msra.mxu0 %v2480_v25 }
 0x21d   : > { %2485 = vmatprep.subr.bf16.mxu0 %v2484_v34 }
 0x220   : > { %2487 = vmatpush3.bf16.msra.mxu0 %v2484_v34 }
 0x221   : > { %2489 = vmatprep.subr.bf16.mxu0 %v2488_v43 }
 0x224   : > { %2491 = vmatpush3.bf16.msra.mxu0 %v2488_v43  ;;  %v1477_v43 = vld [vmem:[#allocation11 + $0x40] sm:$0xff] }
 0x225   : > { %2493 = vmatprep.subr.bf16.mxu0 %v2492_v50 }
 0x228   : > { %2495 = vmatpush3.bf16.msra.mxu0 %v2492_v50 }
 0x271   : > { %v828_v12 = vpop.permute.xlu0 %827  ;;  %v843_v20 = vpop.permute.xlu1 %842 }
 0x272   : > { %v881_v15 = vmul.f32 %v828_v12, %v769_v8  ;;  %v884_v31 = vmul.f32 %v843_v20, %v772_v23  ;;  %v1471_v8 = vld [vmem:[#allocation11 + $0x10] sm:$0xff]  ;;  %v1473_v12 = vld [vmem:[#allocation11 + $0x20] sm:$0xff] }
 0x273   : > { %v2500_v11 = vpack.c.bf16 %v1472_v10, %v1471_v8  ;;  %v2504_v14 = vpack.c.bf16 %v1474_v13, %v1473_v12  ;;  %v1484_v8 = vld [vmem:[#allocation11 + $0x78] sm:$0xff] }
 0x274   : > { %2305 = vmatprep.mubr.f32.mxu0 %v881_v15  ;;  %v1475_v15 = vld [vmem:[#allocation11 + $0x30] sm:$0xff]  ;;  %v2524_v9 = vpack.c.bf16 %v1484_v8, %v1483_v7 }
 0x275   : > { %v838_v21 = vpop.permute.xlu0 %837  ;;  %2306 = vmatmul.mubr.f32.gmra.mrb[6].mxu0 %v882_v22  ;;  %v853_v29 = vpop.permute.xlu1 %852  ;;  %2501 = vmatprep.subr.bf16.mxu1 %v2500_v11 }
 0x276   : > { %v883_v24 = vmul.f32 %v838_v21, %v771_v17  ;;  %v886_v40 = vmul.f32 %v853_v29, %v774_v32  ;;  %2503 = vmatpush3.bf16.msra.mxu1 %v2500_v11  ;;  %v2508_v17 = vpack.c.bf16 %v1476_v16, %v1475_v15 }
 0x277   : > { %2505 = vmatprep.subr.bf16.mxu1 %v2504_v14 }
 0x278   : > { %2308 = vmatprep.mubr.f32.mxu0 %v883_v24 }
 0x279   : > { %v848_v30 = vpop.permute.xlu0 %847  ;;  %2309 = vmatmul.mubr.f32.gmra.mrb[8].mxu0 %v884_v31  ;;  %v863_v38 = vpop.permute.xlu1 %862 }
 0x27a   : > { %v885_v33 = vmul.f32 %v848_v30, %v773_v26  ;;  %v888_v48 = vmul.f32 %v863_v38, %v776_v41  ;;  %2507 = vmatpush3.bf16.msra.mxu1 %v2504_v14 }
 0x27b   : > { %2509 = vmatprep.subr.bf16.mxu1 %v2508_v17 }
 0x27c   : > { %2311 = vmatprep.mubr.f32.mxu0 %v885_v33 }
 0x27d   : > { %v858_v39 = vpop.permute.xlu0 %857  ;;  %2312 = vmatmul.mubr.f32.gmra.mrb[10].mxu0 %v886_v40  ;;  %v873_v51 = vpop.permute.xlu1 %872 }
 0x27e   : > { %v887_v42 = vmul.f32 %v858_v39, %v775_v35  ;;  %v890_v53 = vmul.f32 %v873_v51, %v778_v52  ;;  %2511 = vmatpush3.bf16.msra.mxu1 %v2508_v17  ;;  %v1479_v52 = vld [vmem:[#allocation11 + $0x50] sm:$0xff] }
 0x280   : > { %2314 = vmatprep.mubr.f32.mxu0 %v887_v42 }
 0x281   : > { %v868_v47 = vpop.permute.xlu0 %867  ;;  %2315 = vmatmul.mubr.f32.gmra.mrb[12].mxu0 %v888_v48 }
 0x282   : > { %v889_v49 = vmul.f32 %v868_v47, %v777_v44  ;;  %v1478_v44 = vld [vmem:[#allocation11 + $0x48] sm:$0xff] }
 0x283   : > { %v2512_v46 = vpack.c.bf16 %v1478_v44, %v1477_v43 }
 0x284   : > { %2317 = vmatprep.mubr.f32.mxu0 %v889_v49 }
 0x285   : > { %2318 = vmatmul.mubr.f32.gmra.mrb[14].mxu0 %v890_v53  ;;  %2513 = vmatprep.subr.bf16.mxu1 %v2512_v46  ;;  %v1480_v53 = vld [vmem:[#allocation11 + $0x58] sm:$0xff] }
 0x286   : > { %2352 = vmatprep.mubr.f32.mxu0 %v891_v54  ;;  %2515 = vmatpush3.bf16.msra.mxu1 %v2512_v46 }
 0x289   : > { %2353 = vmatmul.mubr.f32.vlgmr.msra.gmra.mrb[0].mxu0 %v892_v55  ;;  %v2516_v55 = vpack.c.bf16 %v1480_v53, %v1479_v52 }
 0x28a   : > { %2355 = vmatprep.mubr.f32.mxu0 %v893_v56 }
 0x28b   : > { %2517 = vmatprep.subr.bf16.mxu1 %v2516_v55 }
 0x28c   : > { %2519 = vmatpush3.bf16.msra.mxu1 %v2516_v55 }
 0x28d   : > { %2356 = vmatmul.mubr.f32.gmra.mrb[2].mxu0 %v894_v57 }
 0x28e   : > { %2358 = vmatprep.mubr.f32.mxu0 %v895_v58 }
 0x291   : > { %2359 = vmatmul.mubr.f32.gmra.mrb[4].mxu0 %v896_v59 }
 0x292   : > { %2361 = vmatprep.mubr.f32.mxu0 %v897_v60 }
 0x295   : > { %2362 = vmatmul.mubr.f32.gmra.mrb[6].mxu0 %v898_v61 }
 0x296   : > { %2364 = vmatprep.mubr.f32.mxu0 %v899_v62  ;;  %v1481_v62 = vld [vmem:[#allocation11 + $0x60] sm:$0xff] }
 0x299   : > { %2365 = vmatmul.mubr.f32.gmra.mrb[8].mxu0 %v900_v63  ;;  %v1482_v63 = vld [vmem:[#allocation11 + $0x68] sm:$0xff] }
 0x29a   : > { %2367 = vmatprep.mubr.f32.mxu0 %v901_v0  ;;  %v2520_v0 = vpack.c.bf16 %v1482_v63, %v1481_v62 }
 0x29c   : > { %2521 = vmatprep.subr.bf16.mxu1 %v2520_v0 }
 0x29d   : > { %2368 = vmatmul.mubr.f32.gmra.mrb[10].mxu0 %v902_v1  ;;  %2523 = vmatpush3.bf16.msra.mxu1 %v2520_v0 }
 0x29e   : > { %2370 = vmatprep.mubr.f32.mxu0 %v903_v2  ;;  %2525 = vmatprep.subr.bf16.mxu1 %v2524_v9 }
 0x2a1   : > { %2371 = vmatmul.mubr.f32.gmra.mrb[12].mxu0 %v904_v3  ;;  %2527 = vmatpush3.bf16.msra.mxu1 %v2524_v9 }
 0x2a2   : > { %2373 = vmatprep.mubr.f32.mxu0 %v905_v4 }
 0x2a5   : > { %2374 = vmatmul.mubr.f32.gmra.mrb[14].mxu0 %v906_v5 }
 0x35c   : > { %v3684_v18 = vpop.f32.mrb[0].mxu0 }
 0x35d   : > { %v3686_v19 = vpop.f32.mrb[1].mxu0  ;;  %v3689_v20 = vmax.f32 %v3684_v18, 0.0  ;;  %v1230_v15 = vmul.f32 %v3684_v18, %v3684_v18 }
 0x35e   : > { %v3692_v21 = vmax.f32 %v3686_v19, 0.0  ;;  %v1229_v14 = vmul.f32 %v3686_v19, %v3686_v19 }
 0x35f   : > { %v1358_v22 = vmul.f32 %v3689_v20, %v3689_v20 }
 0x360   : > { %v3696_v23 = vpop.f32.mrb[2].mxu0  ;;  %v1357_v24 = vmul.f32 %v3692_v21, %v3692_v21 }
 0x361   : > { %1375 = vadd.xlane.f32.xlu1 %v1358_v22  ;;  %v3700_v25 = vpop.f32.mrb[3].mxu0  ;;  %v3710_v29 = vmax.f32 %v3696_v23, 0.0  ;;  %v1232_v17 = vmul.f32 %v3696_v23, %v3696_v23 }
 0x362   : > { %1373 = vadd.xlane.f32.xlu0 %v1357_v24  ;;  %v3703_v26 = vmax.f32 %v3700_v25, 0.0  ;;  %v1231_v16 = vmul.f32 %v3700_v25, %v3700_v25 }
 0x363   : > { %v1360_v33 = vmul.f32 %v3710_v29, %v3710_v29 }
 0x364   : > { %v3705_v27 = vpop.f32.mrb[4].mxu0  ;;  %v1359_v28 = vmul.f32 %v3703_v26, %v3703_v26 }
 0x365   : > { %v3712_v30 = vpop.f32.mrb[5].mxu0  ;;  %v3724_v35 = vmax.f32 %v3705_v27, 0.0  ;;  %v1234_v24 = vmul.f32 %v3705_v27, %v3705_v27 }
 0x366   : > { %1377 = vadd.xlane.f32.xlu0 %v1359_v28  ;;  %v3715_v31 = vmax.f32 %v3712_v30, 0.0  ;;  %v1233_v22 = vmul.f32 %v3712_v30, %v3712_v30 }
 0x367   : > { %v1362_v39 = vmul.f32 %v3724_v35, %v3724_v35 }
 0x368   : > { %v3717_v32 = vpop.f32.mrb[6].mxu0  ;;  %v1361_v34 = vmul.f32 %v3715_v31, %v3715_v31 }
 0x369   : > { %v3726_v36 = vpop.f32.mrb[7].mxu0  ;;  %v3738_v41 = vmax.f32 %v3717_v32, 0.0 }
 0x36a   : > { %1379 = vadd.xlane.f32.xlu0 %v1360_v33  ;;  %1381 = vadd.xlane.f32.xlu1 %v1361_v34  ;;  %v3729_v37 = vmax.f32 %v3726_v36, 0.0  ;;  %v1235_v28 = vmul.f32 %v3726_v36, %v3726_v36  ;;  %v1236_v33 = vmul.f32 %v3717_v32, %v3717_v32 }
 0x36b   : > { %v1364_v48 = vmul.f32 %v3738_v41, %v3738_v41 }
 0x36c   : > { %v3731_v38 = vpop.f32.mrb[8].mxu0  ;;  %v1363_v40 = vmul.f32 %v3729_v37, %v3729_v37 }
 0x36d   : > { %v3740_v42 = vpop.f32.mrb[9].mxu0  ;;  %v3752_v50 = vmax.f32 %v3731_v38, 0.0 }
 0x36e   : > { %1383 = vadd.xlane.f32.xlu0 %v1362_v39  ;;  %1385 = vadd.xlane.f32.xlu1 %v1363_v40  ;;  %v3743_v45 = vmax.f32 %v3740_v42, 0.0  ;;  %v1237_v34 = vmul.f32 %v3740_v42, %v3740_v42  ;;  %v1238_v39 = vmul.f32 %v3731_v38, %v3731_v38 }
 0x36f   : > { %v1366_v57 = vmul.f32 %v3752_v50, %v3752_v50 }
 0x370   : > { %v3745_v47 = vpop.f32.mrb[10].mxu0  ;;  %v1365_v49 = vmul.f32 %v3743_v45, %v3743_v45 }
 0x371   : > { %v3754_v51 = vpop.f32.mrb[11].mxu0  ;;  %v3766_v59 = vmax.f32 %v3745_v47, 0.0  ;;  %v1240_v43 = vmul.f32 %v3745_v47, %v3745_v47 }
 0x372   : > { %1387 = vadd.xlane.f32.xlu0 %v1364_v48  ;;  %1389 = vadd.xlane.f32.xlu1 %v1365_v49  ;;  %v3757_v54 = vmax.f32 %v3754_v51, 0.0  ;;  %v1239_v40 = vmul.f32 %v3754_v51, %v3754_v51 }
 0x373   : > { %v1368_v2 = vmul.f32 %v3766_v59, %v3766_v59 }
 0x374   : > { %v3759_v56 = vpop.f32.mrb[12].mxu0  ;;  %v1367_v58 = vmul.f32 %v3757_v54, %v3757_v54 }
 0x375   : > { %v3768_v60 = vpop.f32.mrb[13].mxu0  ;;  %v3780_v4 = vmax.f32 %v3759_v56, 0.0  ;;  %v1242_v46 = vmul.f32 %v3759_v56, %v3759_v56 }
 0x376   : > { %1391 = vadd.xlane.f32.xlu0 %v1366_v57  ;;  %1393 = vadd.xlane.f32.xlu1 %v1367_v58  ;;  %v3771_v61 = vmax.f32 %v3768_v60, 0.0  ;;  %v1241_v44 = vmul.f32 %v3768_v60, %v3768_v60 }
 0x377   : > { %v1370_v10 = vmul.f32 %v3780_v4, %v3780_v4 }
 0x378   : > { %v3773_v1 = vpop.f32.mrb[14].mxu0  ;;  %v1369_v3 = vmul.f32 %v3771_v61, %v3771_v61 }
 0x379   : > { %v3782_v5 = vpop.f32.mrb[15].mxu0  ;;  %v3792_v12 = vmax.f32 %v3773_v1, 0.0  ;;  %v1244_v49 = vmul.f32 %v3773_v1, %v3773_v1 }
 0x37a   : > { %v3785_v6 = vmax.f32 %v3782_v5, 0.0  ;;  %1395 = vadd.xlane.f32.xlu0 %v1368_v2  ;;  %1397 = vadd.xlane.f32.xlu1 %v1369_v3  ;;  %v1243_v48 = vmul.f32 %v3782_v5, %v3782_v5 }
 0x37b   : > { %v1372_v13 = vmul.f32 %v3792_v12, %v3792_v12 }
 0x37c   : > { %v1371_v11 = vmul.f32 %v3785_v6, %v3785_v6 }
 0x37e   : > { %1399 = vadd.xlane.f32.xlu0 %v1370_v10  ;;  %1401 = vadd.xlane.f32.xlu1 %v1371_v11 }
 0x382   : > { %1403 = vadd.xlane.f32.xlu0 %v1372_v13  ;;  %1245 = vadd.xlane.f32.xlu1 %v1229_v14 }
 0x386   : > { %1247 = vadd.xlane.f32.xlu0 %v1230_v15  ;;  %1249 = vadd.xlane.f32.xlu1 %v1231_v16 }
 0x38a   : > { %1251 = vadd.xlane.f32.xlu0 %v1232_v17  ;;  %1253 = vadd.xlane.f32.xlu1 %v1233_v22 }
 0x38e   : > { %1255 = vadd.xlane.f32.xlu0 %v1234_v24  ;;  %1257 = vadd.xlane.f32.xlu1 %v1235_v28 }
 0x392   : > { %1259 = vadd.xlane.f32.xlu0 %v1236_v33  ;;  %1261 = vadd.xlane.f32.xlu1 %v1237_v34 }
 0x396   : > { %1263 = vadd.xlane.f32.xlu0 %v1238_v39  ;;  %1265 = vadd.xlane.f32.xlu1 %v1239_v40 }
 0x39a   : > { %1267 = vadd.xlane.f32.xlu0 %v1240_v43  ;;  %1269 = vadd.xlane.f32.xlu1 %v1241_v44 }
 0x39e   : > { %1271 = vadd.xlane.f32.xlu0 %v1242_v46  ;;  %1273 = vadd.xlane.f32.xlu1 %v1243_v48 }
 0x3a2   : > { %1275 = vadd.xlane.f32.xlu0 %v1244_v49 }
 0x3ee   : > { %v1376_v52 = vpop.xlane.xlu1 %1375 }
 0x3ef   : > { %v1406_v53 = vmax.f32 %v1376_v52, 1e-24  ;;  %v1374_v55 = vpop.xlane.xlu0 %1373 }
 0x3f0   : > { %v1405_v57 = vmax.f32 %v1374_v55, 1e-24 }
 0x3f1   : > { %2753 = vrsqrt.f32 %v1406_v53 }
 0x3f2   : > { %2755 = vrsqrt.f32 %v1405_v57 }
 0x3f3   : > { %v1378_v58 = vpop.xlane.xlu0 %1377 }
 0x3f4   : > { %v1407_v62 = vmax.f32 %v1378_v58, 1e-24 }
 0x3f6   : > { %2757 = vrsqrt.f32 %v1407_v62 }
 0x3f7   : > { %v1380_v63 = vpop.xlane.xlu0 %1379  ;;  %v1382_v0 = vpop.xlane.xlu1 %1381 }
 0x3f8   : > { %v1408_v2 = vmax.f32 %v1380_v63, 1e-24  ;;  %v1409_v3 = vmax.f32 %v1382_v0, 1e-24 }
 0x3fa   : > { %2759 = vrsqrt.f32 %v1408_v2 }
 0x3fb   : > { %v2754_v7 = vpop.eup %2753  ;;  %2761 = vrsqrt.f32 %v1409_v3  ;;  %v1384_v8 = vpop.xlane.xlu0 %1383 }
 0x3fc   : > { %v1386_v9 = vpop.xlane.xlu1 %1385  ;;  %v2756_v10 = vpop.eup %2755  ;;  %v1410_v11 = vmax.f32 %v1384_v8, 1e-24  ;;  %v1438_v14 = vmul.f32 %v2754_v7, %v3689_v20 }
 0x3fd   : > { %v1411_v13 = vmax.f32 %v1386_v9, 1e-24  ;;  %v1437_v15 = vmul.f32 %v2756_v10, %v3692_v21 }
 0x3fe   : > { %2763 = vrsqrt.f32 %v1410_v11  ;;  %1454 = vst [vmem:[%s3634_s0 + $0x8] sm:$0xff] %v1438_v14 }
 0x3ff   : > { %2765 = vrsqrt.f32 %v1411_v13  ;;  %1453 = vst [vmem:[%s3634_s0] sm:$0xff] %v1437_v15  ;;  %2408 = vmatprep.mubr.f32.mxu1 %v1437_v15  ;;  %v1388_v16 = vpop.xlane.xlu0 %1387 }
 0x400   : > { %v1390_v17 = vpop.xlane.xlu1 %1389  ;;  %v2758_v22 = vpop.eup %2757  ;;  %v1412_v24 = vmax.f32 %v1388_v16, 1e-24  ;;  %2409 = vmatmul.mubr.f32.vlgmr.msra.gmra.mrb[0].mxu1 %v1438_v14 }
 0x401   : > { %v1413_v28 = vmax.f32 %v1390_v17, 1e-24  ;;  %v1439_v33 = vmul.f32 %v2758_v22, %v3703_v26 }
 0x402   : > { %2767 = vrsqrt.f32 %v1412_v24 }
 0x403   : > { %2769 = vrsqrt.f32 %v1413_v28  ;;  %1455 = vst [vmem:[%s3634_s0 + $0x10] sm:$0xff] %v1439_v33  ;;  %2411 = vmatprep.mubr.f32.mxu1 %v1439_v33  ;;  %v1392_v20 = vpop.xlane.xlu0 %1391 }
 0x404   : > { %v1394_v21 = vpop.xlane.xlu1 %1393  ;;  %v2760_v34 = vpop.eup %2759  ;;  %v1414_v39 = vmax.f32 %v1392_v20, 1e-24 }
 0x405   : > { %v1415_v40 = vmax.f32 %v1394_v21, 1e-24  ;;  %v2762_v43 = vpop.eup %2761  ;;  %v1440_v44 = vmul.f32 %v2760_v34, %v3710_v29 }
 0x406   : > { %2771 = vrsqrt.f32 %v1414_v39  ;;  %v1441_v46 = vmul.f32 %v2762_v43, %v3715_v31 }
 0x407   : > { %2773 = vrsqrt.f32 %v1415_v40  ;;  %1456 = vst [vmem:[%s3634_s0 + $0x18] sm:$0xff] %v1440_v44  ;;  %2412 = vmatmul.mubr.f32.gmra.mrb[2].mxu1 %v1440_v44  ;;  %v1396_v26 = vpop.xlane.xlu0 %1395 }
 0x408   : > { %v1398_v48 = vpop.xlane.xlu1 %1397  ;;  %v2764_v49 = vpop.eup %2763  ;;  %v1416_v52 = vmax.f32 %v1396_v26, 1e-24  ;;  %1457 = vst [vmem:[%s3634_s0 + $0x20] sm:$0xff] %v1441_v46  ;;  %2414 = vmatprep.mubr.f32.mxu1 %v1441_v46 }
 0x409   : > { %v1417_v53 = vmax.f32 %v1398_v48, 1e-24  ;;  %v2766_v55 = vpop.eup %2765  ;;  %v1442_v57 = vmul.f32 %v2764_v49, %v3724_v35 }
 0x40a   : > { %2775 = vrsqrt.f32 %v1416_v52  ;;  %v1443_v29 = vmul.f32 %v2766_v55, %v3729_v37 }
 0x40b   : > { %2777 = vrsqrt.f32 %v1417_v53  ;;  %1458 = vst [vmem:[%s3634_s0 + $0x28] sm:$0xff] %v1442_v57  ;;  %2415 = vmatmul.mubr.f32.gmra.mrb[4].mxu1 %v1442_v57  ;;  %v1400_v31 = vpop.xlane.xlu0 %1399 }
 0x40c   : > { %v1402_v58 = vpop.xlane.xlu1 %1401  ;;  %v2768_v62 = vpop.eup %2767  ;;  %v1418_v63 = vmax.f32 %v1400_v31, 1e-24  ;;  %1459 = vst [vmem:[%s3634_s0 + $0x30] sm:$0xff] %v1443_v29  ;;  %2417 = vmatprep.mubr.f32.mxu1 %v1443_v29 }
 0x40d   : > { %v1419_v0 = vmax.f32 %v1402_v58, 1e-24  ;;  %v2770_v2 = vpop.eup %2769  ;;  %v1444_v3 = vmul.f32 %v2768_v62, %v3738_v41 }
 0x40e   : > { %2779 = vrsqrt.f32 %v1418_v63  ;;  %v1445_v35 = vmul.f32 %v2770_v2, %v3743_v45 }
 0x40f   : > { %2781 = vrsqrt.f32 %v1419_v0  ;;  %1460 = vst [vmem:[%s3634_s0 + $0x38] sm:$0xff] %v1444_v3  ;;  %2418 = vmatmul.mubr.f32.gmra.mrb[6].mxu1 %v1444_v3  ;;  %v1404_v37 = vpop.xlane.xlu0 %1403 }
 0x410   : > { %v1246_v7 = vpop.xlane.xlu1 %1245  ;;  %v2772_v8 = vpop.eup %2771  ;;  %v1420_v9 = vmax.f32 %v1404_v37, 1e-24  ;;  %1461 = vst [vmem:[%s3634_s0 + $0x40] sm:$0xff] %v1445_v35  ;;  %2420 = vmatprep.mubr.f32.mxu1 %v1445_v35 }
 0x411   : > { %v1277_v10 = vmax.f32 %v1246_v7, 1e-24  ;;  %v2774_v11 = vpop.eup %2773  ;;  %v1446_v13 = vmul.f32 %v2772_v8, %v3752_v50 }
 0x412   : > { %2783 = vrsqrt.f32 %v1420_v9  ;;  %v1447_v41 = vmul.f32 %v2774_v11, %v3757_v54 }
 0x413   : > { %2785 = vrsqrt.f32 %v1277_v10  ;;  %1462 = vst [vmem:[%s3634_s0 + $0x48] sm:$0xff] %v1446_v13  ;;  %2421 = vmatmul.mubr.f32.gmra.mrb[8].mxu1 %v1446_v13  ;;  %v1248_v45 = vpop.xlane.xlu0 %1247 }
 0x414   : > { %v1250_v14 = vpop.xlane.xlu1 %1249  ;;  %v2776_v15 = vpop.eup %2775  ;;  %v1278_v16 = vmax.f32 %v1248_v45, 1e-24  ;;  %1463 = vst [vmem:[%s3634_s0 + $0x50] sm:$0xff] %v1447_v41  ;;  %2423 = vmatprep.mubr.f32.mxu1 %v1447_v41 }
 0x415   : > { %v1279_v17 = vmax.f32 %v1250_v14, 1e-24  ;;  %v2778_v22 = vpop.eup %2777  ;;  %v1448_v24 = vmul.f32 %v2776_v15, %v3766_v59 }
 0x416   : > { %2787 = vrsqrt.f32 %v1278_v16  ;;  %v1449_v50 = vmul.f32 %v2778_v22, %v3771_v61 }
 0x417   : > { %2789 = vrsqrt.f32 %v1279_v17  ;;  %1464 = vst [vmem:[%s3634_s0 + $0x58] sm:$0xff] %v1448_v24  ;;  %2424 = vmatmul.mubr.f32.gmra.mrb[10].mxu1 %v1448_v24  ;;  %v1252_v54 = vpop.xlane.xlu0 %1251 }
 0x418   : > { %v1254_v28 = vpop.xlane.xlu1 %1253  ;;  %v2780_v33 = vpop.eup %2779  ;;  %v1280_v20 = vmax.f32 %v1252_v54, 1e-24  ;;  %1465 = vst [vmem:[%s3634_s0 + $0x60] sm:$0xff] %v1449_v50  ;;  %2426 = vmatprep.mubr.f32.mxu1 %v1449_v50 }
 0x419   : > { %v1281_v21 = vmax.f32 %v1254_v28, 1e-24  ;;  %v2782_v34 = vpop.eup %2781  ;;  %v1450_v39 = vmul.f32 %v2780_v33, %v3780_v4 }
 0x41a   : > { %2791 = vrsqrt.f32 %v1280_v20  ;;  %v1451_v59 = vmul.f32 %v2782_v34, %v3785_v6 }
 0x41b   : > { %2793 = vrsqrt.f32 %v1281_v21  ;;  %1466 = vst [vmem:[%s3634_s0 + $0x68] sm:$0xff] %v1450_v39  ;;  %2427 = vmatmul.mubr.f32.gmra.mrb[12].mxu1 %v1450_v39  ;;  %v1256_v61 = vpop.xlane.xlu0 %1255 }
 0x41c   : > { %v1258_v40 = vpop.xlane.xlu1 %1257  ;;  %v2784_v43 = vpop.eup %2783  ;;  %v1282_v44 = vmax.f32 %v1256_v61, 1e-24  ;;  %1467 = vst [vmem:[%s3634_s0 + $0x70] sm:$0xff] %v1451_v59  ;;  %2429 = vmatprep.mubr.f32.mxu1 %v1451_v59 }
 0x41d   : > { %v1283_v46 = vmax.f32 %v1258_v40, 1e-24  ;;  %v2786_v26 = vpop.eup %2785  ;;  %v1452_v48 = vmul.f32 %v2784_v43, %v3792_v12 }
 0x41e   : > { %v1309_v4 = vmul.f32 %v2786_v26, %v3686_v19  ;;  %2795 = vrsqrt.f32 %v1282_v44 }
 0x41f   : > { %2797 = vrsqrt.f32 %v1283_v46  ;;  %v1260_v6 = vpop.xlane.xlu0 %1259  ;;  %1468 = vst [vmem:[%s3634_s0 + $0x78] sm:$0xff] %v1452_v48  ;;  %2430 = vmatmul.mubr.f32.gmra.mrb[14].mxu1 %v1452_v48 }
 0x420   : > { %v1262_v49 = vpop.xlane.xlu1 %1261  ;;  %v2788_v52 = vpop.eup %2787  ;;  %1325 = vst [vmem:[%s3632_s26] sm:$0xff] %v1309_v4  ;;  %v1284_v53 = vmax.f32 %v1260_v6, 1e-24 }
 0x421   : > { %v1285_v55 = vmax.f32 %v1262_v49, 1e-24  ;;  %v2790_v57 = vpop.eup %2789  ;;  %v1310_v29 = vmul.f32 %v2788_v52, %v3684_v18 }
 0x422   : > { %v1311_v12 = vmul.f32 %v2790_v57, %v3700_v25  ;;  %2799 = vrsqrt.f32 %v1284_v53 }
 0x423   : > { %1326 = vst [vmem:[%s3632_s26 + $0x8] sm:$0xff] %v1310_v29  ;;  %2801 = vrsqrt.f32 %v1285_v55  ;;  %v1264_v19 = vpop.xlane.xlu0 %1263 }
 0x424   : > { %v1266_v31 = vpop.xlane.xlu1 %1265  ;;  %v2792_v58 = vpop.eup %2791  ;;  %1327 = vst [vmem:[%s3632_s26 + $0x10] sm:$0xff] %v1311_v12  ;;  %v1286_v62 = vmax.f32 %v1264_v19, 1e-24 }
 0x425   : > { %v1287_v63 = vmax.f32 %v1266_v31, 1e-24  ;;  %v2794_v0 = vpop.eup %2793  ;;  %v1312_v2 = vmul.f32 %v2792_v58, %v3696_v23 }
 0x426   : > { %v1313_v3 = vmul.f32 %v2794_v0, %v3712_v30  ;;  %2803 = vrsqrt.f32 %v1286_v62 }
 0x427   : > { %1328 = vst [vmem:[%s3632_s26 + $0x18] sm:$0xff] %v1312_v2  ;;  %2805 = vrsqrt.f32 %v1287_v63  ;;  %v1268_v18 = vpop.xlane.xlu0 %1267 }
 0x428   : > { %v1270_v25 = vpop.xlane.xlu1 %1269  ;;  %v2796_v35 = vpop.eup %2795  ;;  %1329 = vst [vmem:[%s3632_s26 + $0x20] sm:$0xff] %v1313_v3  ;;  %v1288_v37 = vmax.f32 %v1268_v18, 1e-24 }
 0x429   : > { %v1289_v7 = vmax.f32 %v1270_v25, 1e-24  ;;  %v2798_v8 = vpop.eup %2797  ;;  %v1314_v9 = vmul.f32 %v2796_v35, %v3705_v27 }
 0x42a   : > { %v1315_v10 = vmul.f32 %v2798_v8, %v3726_v36  ;;  %2807 = vrsqrt.f32 %v1288_v37 }
 0x42b   : > { %1330 = vst [vmem:[%s3632_s26 + $0x28] sm:$0xff] %v1314_v9  ;;  %2809 = vrsqrt.f32 %v1289_v7  ;;  %v1272_v23 = vpop.xlane.xlu0 %1271 }
 0x42c   : > { %v1274_v30 = vpop.xlane.xlu1 %1273  ;;  %v2800_v11 = vpop.eup %2799  ;;  %1331 = vst [vmem:[%s3632_s26 + $0x30] sm:$0xff] %v1315_v10  ;;  %v1290_v13 = vmax.f32 %v1272_v23, 1e-24 }
 0x42d   : > { %v1291_v41 = vmax.f32 %v1274_v30, 1e-24  ;;  %v2802_v45 = vpop.eup %2801  ;;  %v1316_v14 = vmul.f32 %v2800_v11, %v3717_v32 }
 0x42e   : > { %v1317_v15 = vmul.f32 %v2802_v45, %v3740_v42  ;;  %2811 = vrsqrt.f32 %v1290_v13 }
 0x42f   : > { %1332 = vst [vmem:[%s3632_s26 + $0x38] sm:$0xff] %v1316_v14  ;;  %2813 = vrsqrt.f32 %v1291_v41  ;;  %v1276_v27 = vpop.xlane.xlu0 %1275 }
 0x430   : > { %v2804_v36 = vpop.eup %2803  ;;  %1333 = vst [vmem:[%s3632_s26 + $0x40] sm:$0xff] %v1317_v15  ;;  %v1292_v16 = vmax.f32 %v1276_v27, 1e-24 }
 0x431   : > { %v2806_v17 = vpop.eup %2805  ;;  %v1318_v22 = vmul.f32 %v2804_v36, %v3731_v38 }
 0x432   : > { %v1319_v24 = vmul.f32 %v2806_v17, %v3754_v51  ;;  %2815 = vrsqrt.f32 %v1292_v16 }
 0x433   : > { %1334 = vst [vmem:[%s3632_s26 + $0x48] sm:$0xff] %v1318_v22 }
 0x434   : > { %v2808_v32 = vpop.eup %2807  ;;  %1335 = vst [vmem:[%s3632_s26 + $0x50] sm:$0xff] %v1319_v24 }
 0x435   : > { %v2810_v42 = vpop.eup %2809  ;;  %v1320_v50 = vmul.f32 %v2808_v32, %v3745_v47 }
 0x436   : > { %v1321_v54 = vmul.f32 %v2810_v42, %v3768_v60 }
 0x437   : > { %1336 = vst [vmem:[%s3632_s26 + $0x58] sm:$0xff] %v1320_v50 }
 0x438   : > { %v2812_v28 = vpop.eup %2811  ;;  %1337 = vst [vmem:[%s3632_s26 + $0x60] sm:$0xff] %v1321_v54 }
 0x439   : > { %v2814_v33 = vpop.eup %2813  ;;  %v1322_v38 = vmul.f32 %v2812_v28, %v3759_v56 }
 0x43a   : > { %v1323_v51 = vmul.f32 %v2814_v33, %v3782_v5 }
 0x43b   : > { %1338 = vst [vmem:[%s3632_s26 + $0x68] sm:$0xff] %v1322_v38 }
 0x43c   : > { %v2816_v20 = vpop.eup %2815  ;;  %1339 = vst [vmem:[%s3632_s26 + $0x70] sm:$0xff] %v1323_v51 }
 0x43d   : > { %v1324_v21 = vmul.f32 %v2816_v20, %v3773_v1 }
 0x43f   : > { %1340 = vst [vmem:[%s3632_s26 + $0x78] sm:$0xff] %v1324_v21 }
 0x4d3   : > { %v2410_v47 = vpop.f32.mrb[0].mxu1 }
 0x4d4   : > { %v1551_v34 = vpop.f32.mrb[1].mxu1 }
 0x4d5   : > { %v2076_v60 = vpack.c.bf16 %v2410_v47, %v1551_v34 }
 0x4d7   : > { %2077 = vst [vmem:[%s3636_s27] sm:$0xff] %v2076_v60  }
 0x4da   : > { %v2413_v39 = vpop.f32.mrb[2].mxu1 }
 0x4db   : > { %v1561_v59 = vpop.f32.mrb[3].mxu1 }
 0x4dc   : > { %v2081_v61 = vpack.c.bf16 %v2413_v39, %v1561_v59 }
 0x4de   : > { %2113 = vst [vmem:[%s3636_s27 + $0x8] sm:$0xff] %v2081_v61   ;;  %v2416_v56 = vpop.f32.mrb[4].mxu1 }
 0x4df   : > { %v1571_v5 = vpop.f32.mrb[5].mxu1 }
 0x4e0   : > { %v2086_v40 = vpack.c.bf16 %v2416_v56, %v1571_v5 }
 0x4e2   : > { %2114 = vst [vmem:[%s3636_s27 + $0x10] sm:$0xff] %v2086_v40   ;;  %v2419_v43 = vpop.f32.mrb[6].mxu1 }
 0x4e3   : > { %v1581_v44 = vpop.f32.mrb[7].mxu1 }
 0x4e4   : > { %v2091_v1 = vpack.c.bf16 %v2419_v43, %v1581_v44 }
 0x4e6   : > { %2115 = vst [vmem:[%s3636_s27 + $0x18] sm:$0xff] %v2091_v1   ;;  %v2422_v46 = vpop.f32.mrb[8].mxu1 }
 0x4e7   : > { %v1591_v26 = vpop.f32.mrb[9].mxu1 }
 0x4e8   : > { %v2096_v48 = vpack.c.bf16 %v2422_v46, %v1591_v26 }
 0x4ea   : > { %2116 = vst [vmem:[%s3636_s27 + $0x20] sm:$0xff] %v2096_v48   ;;  %v2425_v4 = vpop.f32.mrb[10].mxu1 }
 0x4eb   : > { %v1601_v6 = vpop.f32.mrb[11].mxu1 }
 0x4ec   : > { %v2101_v49 = vpack.c.bf16 %v2425_v4, %v1601_v6 }
 0x4ee   : > { %2117 = vst [vmem:[%s3636_s27 + $0x28] sm:$0xff] %v2101_v49   ;;  %v2428_v52 = vpop.f32.mrb[12].mxu1 }
 0x4ef   : > { %v1611_v53 = vpop.f32.mrb[13].mxu1 }
 0x4f0   : > { %v2106_v55 = vpack.c.bf16 %v2428_v52, %v1611_v53 }
 0x4f2   : > { %2118 = vst [vmem:[%s3636_s27 + $0x30] sm:$0xff] %v2106_v55   ;;  %v2431_v57 = vpop.f32.mrb[14].mxu1 }
 0x4f3   : > { %v1621_v29 = vpop.f32.mrb[15].mxu1 }
 0x4f4   : > { %v2111_v12 = vpack.c.bf16 %v2431_v57, %v1621_v29 }
 0x4f6   : > { %2119 = vst [vmem:[%s3636_s27 + $0x38] sm:$0xff] %v2111_v12  }
 0x4f7 PF: > { %s4157_s15 = sld [smem:[#allocation25_spill]]  ;;  %s4158_s10 = sld [smem:[#allocation26_spill]] }
 0x4f8   : > { %s4159_s18 = sld [smem:[#allocation28_spill]]  ;;  %s4160_s6 = sld [smem:[#allocation40_spill]] }
 0x4f9   : > { %s1750_s7 = sshll.u32 %s3634_s0, 4  ;;  %s3193_s30 = smov [#allocation13]   ;;  %s3909_s7 = int_to_ptr.vmem [resolvable:$true] %s1750_s7 }
 0x4fa   : > { %s2961_s12 = scalar_lea.vmem %s3909_s7, 2048  ;;  %s2965_s28 = sshll.u32 %s3193_s30, 4  ;;  %s2966_s28 = int_to_ptr.vmem [resolvable:$false] %s2965_s28 }
 0x4fb   : > { %p2962_p9 = scmp.ne.s32.totalorder %s3909_s7, %s2961_s12  ;;  %s2967_s3 = scalar_lea.vmem %s2966_s28, 4096 }
 0x4fc   : > { %p2968_p11 = scmp.lt.s32.totalorder %s3909_s7, %s2966_s28  ;;  %p2969_p12 = scmp.lt.s32.totalorder %s2967_s3, %s2961_s12 }
 0x4fd   : > { %s2070_s2 = sshll.u32 %s4157_s15, 11  ;;  %s4161_s4 = sand.u32 1, %s4158_s10  }
 0x4fe   : > { %s3906_s8 = scalar_lea.hbm %s4160_s6, %s2070_s2  ;;  %s3913_s23 = scalar_lea.sflag [#allocation14], %s4161_s4 }
 0x4ff   : > { %p4162_p10 = scmp.ne.s32.totalorder %s4159_s18, 0  ;;  %p2970_p0 = por %p2969_p12, %p2968_p11 }
 0x501   : > { %p2963_p4 = pnand %p2962_p9, %p4162_p10 }
 0x503   : > { %p2964_p1 = pneg %p2963_p4 }
 0x505   : > { %p2971_p3 = pnand %p2970_p0, %p2964_p1 }
 0x507   : > { %2974 = shalt.err (!%p2971_p3)
}
 0x508   : > { %s2975_s0 = scalar_lea.hbm %s3906_s8, 2048  ;;  %s2979_s5 = scalar_lea.hbm %s4160_s6, 4096 }
 0x509   : > { %p2976_p13 = scmp.ne.s32.totalorder %s3906_s8, %s2975_s0  ;;  %p2980_p8 = scmp.lt.u32.totalorder %s3906_s8, %s4160_s6 }
 0x50a   : > { %p2981_p7 = scmp.lt.u32.totalorder %s2979_s5, %s2975_s0  ;;  %p2983_p9 = scmp.lt.u32.totalorder %s2975_s0, %s3906_s8 }
 0x50b   : > { %p2977_p6 = pnand %p2976_p13, %p4162_p10 }
 0x50c   : > { %p2982_p5 = por %p2981_p7, %p2980_p8 }
 0x50d   : > { %p2978_p2 = pneg %p2977_p6 }
 0x50e   : > { %p2984_p4 = por %p2983_p9, %p2982_p5 }
 0x510   : > { %p2985_p1 = pnand %p2984_p4, %p2978_p2 }
 0x512   : > { %2988 = shalt.err (!%p2985_p1)
}
 0x513   : > { %s4101_s12 = smov 128   ;;  %s3195_s28 = smov 8  }
 0x514   : > { %2577 = dma.vmem_to_hbm [thread:$0]  (%p4162_p10), %s3909_s7, 2048, %s3906_s8, %s3913_s23, %s4101_s12, %s4101_s12, %s3195_s28  }
 0x515   : > { %s4163_s10 = sld [smem:[#allocation39_spill]]  ;;  %s1734_s4 = sshll.u32 %s3632_s26, 4  ;;  %s3948_s4 = int_to_ptr.vmem [resolvable:$true] %s1734_s4 }
 0x516   : > { %s2072_s30 = sshll.u32 %s4157_s15, 10  ;;  %s1711_s6 = scalar_lea.sflag [#allocation5], %s3617_s9 }
 0x517   : > { %s2989_s24 = scalar_lea.vmem %s3948_s4, 2048  ;;  %s3196_s8 = smov [#allocation12]  }
 0x518   : > { %p2990_p11 = scmp.ne.s32.totalorder %s3948_s4, %s2989_s24  ;;  %s2993_s7 = sshll.u32 %s3196_s8, 4  ;;  %s2994_s7 = int_to_ptr.vmem [resolvable:$false] %s2993_s7 }
 0x519   : > { %s2995_s12 = scalar_lea.vmem %s2994_s7, 4096  ;;  %p2996_p3 = scmp.lt.s32.totalorder %s3948_s4, %s2994_s7 }
 0x51a   : > { %p2991_p12 = pnand %p2990_p11, %p4162_p10  ;;  %p2997_p13 = scmp.lt.s32.totalorder %s2995_s12, %s2989_s24 }
 0x51b   : > { %s4164_s1 = smov %s4163_s10  ;;  %s3945_s5 = scalar_lea.hbm %s4163_s10, %s2070_s2 }
 0x51c   : > { %p2992_p0 = pneg %p2991_p12  ;;  %p2998_p6 = por %p2997_p13, %p2996_p3 }
 0x51e   : > { %p2999_p2 = pnand %p2998_p6, %p2992_p0 }
 0x520   : > { %3002 = shalt.err (!%p2999_p2)
}
 0x521   : > { %s3003_s26 = scalar_lea.hbm %s3945_s5, 2048  ;;  %s3007_s0 = scalar_lea.hbm %s4164_s1, 4096 }
 0x522   : > { %p3004_p8 = scmp.ne.s32.totalorder %s3945_s5, %s3003_s26  ;;  %p3008_p9 = scmp.lt.u32.totalorder %s3945_s5, %s4164_s1 }
 0x523   : > { %p3009_p4 = scmp.lt.u32.totalorder %s3007_s0, %s3003_s26  ;;  %p3011_p11 = scmp.lt.u32.totalorder %s3003_s26, %s3945_s5 }
 0x524   : > { %p3005_p7 = pnand %p3004_p8, %p4162_p10 }
 0x525   : > { %p3010_p1 = por %p3009_p4, %p3008_p9 }
 0x526   : > { %p3006_p5 = pneg %p3005_p7 }
 0x527   : > { %p3012_p12 = por %p3011_p11, %p3010_p1 }
 0x529   : > { %p3013_p0 = pnand %p3012_p12, %p3006_p5 }
 0x52b   : > { %3016 = shalt.err (!%p3013_p0)
}
 0x52c   : > { %s4165_s24 = smov 128   ;;  %s4166_s26 = sld [smem:[#allocation41_spill]] }
 0x52d   : > { %2576 = dma.vmem_to_hbm [thread:$0]  (%p4162_p10), %s3948_s4, 2048, %s3945_s5, %s1711_s6, %s4165_s24, %s4165_s24, %s3195_s28  }
 0x52e   : > { %s1766_s3 = sshll.u32 %s3636_s27, 4  ;;  %s3197_s9 = smov [#allocation15]   ;;  %s3986_s3 = int_to_ptr.vmem [resolvable:$true] %s1766_s3 }
 0x52f   : > { %s3017_s0 = scalar_lea.vmem %s3986_s3, 1024  ;;  %s3021_s10 = sshll.u32 %s3197_s9, 4  ;;  %s3022_s10 = int_to_ptr.vmem [resolvable:$false] %s3021_s10 }
 0x530   : > { %p3018_p3 = scmp.ne.s32.totalorder %s3986_s3, %s3017_s0  ;;  %s3023_s15 = scalar_lea.vmem %s3022_s10, 2048 }
 0x531   : > { %p3024_p2 = scmp.lt.s32.totalorder %s3986_s3, %s3022_s10  ;;  %p3025_p8 = scmp.lt.s32.totalorder %s3023_s15, %s3017_s0 }
 0x532   : > { %s3983_s2 = scalar_lea.hbm %s4166_s26, %s2072_s30  ;;  %p3019_p13 = pnand %p3018_p3, %p4162_p10 }
 0x533   : > { %p3026_p7 = por %p3025_p8, %p3024_p2 }
 0x534   : > { %p3020_p6 = pneg %p3019_p13 }
 0x536   : > { %p3027_p5 = pnand %p3026_p7, %p3020_p6 }
 0x538   : > { %3030 = shalt.err (!%p3027_p5)
}
 0x539   : > { %s3031_s27 = scalar_lea.hbm %s3983_s2, 1024  ;;  %s3035_s5 = scalar_lea.hbm %s4166_s26, 2048 }
 0x53a   : > { %p3032_p9 = scmp.ne.s32.totalorder %s3983_s2, %s3031_s27  ;;  %p3036_p11 = scmp.lt.u32.totalorder %s3983_s2, %s4166_s26 }
 0x53b   : > { %p3037_p12 = scmp.lt.u32.totalorder %s3035_s5, %s3031_s27  ;;  %p3039_p3 = scmp.lt.u32.totalorder %s3031_s27, %s3983_s2 }
 0x53c   : > { %p3033_p4 = pnand %p3032_p9, %p4162_p10 }
 0x53d   : > { %p3038_p0 = por %p3037_p12, %p3036_p11 }
 0x53e   : > { %p3034_p1 = pneg %p3033_p4 }
 0x53f   : > { %p3040_p13 = por %p3039_p3, %p3038_p0 }
 0x541   : > { %p3041_p6 = pnand %p3040_p13, %p3034_p1 }
 0x543   : > { %3044 = shalt.err (!%p3041_p6)
}
 0x544   : > { %s3198_s8 = smov 64   ;;  %s3199_s24 = smov 4  }
 0x545   : > { %2578 = dma.vmem_to_hbm [thread:$0]  (%p4162_p10), %s3986_s3, 1024, %s3983_s2, %s3913_s23, %s3198_s8, %s3198_s8, %s3199_s24  }
 0x546 PF: > { %s4167_s12 = sld [smem:[#allocation22_spill]]  ;;  %s4168_s7 = sld [smem:[#allocation29_spill]] }
 0x547   : > { %p2616_p2 = scmp.ge.s32.totalorder %s3179_s22, 2 }
 0x54c   : > { %s1781_s0 = sand.u32 1, %s4167_s12   ;;  %p4169_p8 = scmp.ne.s32.totalorder %s4168_s7, 0 }
 0x54d   : > { %s1782_s9 = scalar_lea.sflag [#allocation5], %s1781_s0 }
 0x54e   : > { %p2600_p7 = pnand %p2616_p2, %p4169_p8 }
 0x550   : > { %3118 = dma.done.wait (!%p2600_p7), %s1782_s9, 2048  }
 0x551   : > { %3120 = vsyncadd (!%p2600_p7), %s1782_s9, 4294965248  ;;  %s4170_s10 = sadd.s32 4294967294, %s3179_s22  }
 0x552   : > { %s1790_s15 = sand.u32 1, %s4170_s10  }
 0x553   : > { %s1791_s27 = scalar_lea.sflag [#allocation14], %s1790_s15 }
 0x554   : > { %3122 = dma.done.wait (!%p2600_p7), %s1791_s27, 3072  }
 0x555   : > { %3124 = vsyncadd (!%p2600_p7), %s1791_s27, 4294964224  ;;  %s33_s22 = sadd.s32 1, %s3179_s22   ;;  %s4172_s30 = sld [smem:[#allocation23_spill]] }
 0x556   : > { %p4017_p10 = scmp.ge.s32.totalorder %s33_s22, 6   ;;  %s4173_s23 = sld [smem:[#allocation30_spill]] }
 0x557   : > { %s4174_s2 = sld [smem:[#allocation31_spill]]  ;;  %s4176_s10 = smov %s3135_s11 }
 0x558   : > { %s4177_s11 = smov %s3482_s25  ;;  %s4178_s12 = smov %s3143_s13 }
 0x559   : > { %s4179_s13 = smov %s3147_s14  ;;  %s4180_s14 = smov %s3540_s19 }
 0x55a   : > { %s4181_s15 = smov %s3155_s16  ;;  %s4182_s16 = smov %s3159_s17 }
 0x55b   : > { %s4183_s17 = smov %s3485_s29  ;;  %s4184_s18 = smov %s3171_s20 }
 0x55c   : > { %s4185_s19 = smov %s3175_s21  ;;  %s4186_s20 = smov %s4173_s23 }
 0x55d   : > { %s4187_s21 = smov %s4174_s2  ;;  %32 = sbr.rel (!%p4017_p10) target bundleno = 26 (0x1a), region = 164 }
 0x564   :  { %1805 = vsyncpa [#allocation4], 1 }
 0x565   :  { %1807 = vsyncpa [#allocation4 + $0x1], 1 }
 0x566   :  { %1808 = vsyncpa [#allocation7], 1 }
 0x567   :  { %1810 = vsyncpa [#allocation7 + $0x1], 1 }
 0x568   :  { %1811 = vsyncpa [#allocation10], 1 }
 0x569   :  { %1812 = vsyncpa [#allocation5], 1 }
 0x56a   :  { %1814 = vsyncpa [#allocation5 + $0x1], 1 }
 0x56b   :  { %1815 = vsyncpa [#allocation14], 1 }
 0x56c   :  { %1817 = vsyncpa [#allocation14 + $0x1], 1 }

</bundles_post_ra>
